<compile_context>
chip_gen: v6e
topology: v6e:2x2x1
jax: 0.10.0
libtpu: 0.0.40
codegen_flags: <defaults>
</compile_context>

<pallas_src>
import functools

import jax
import jax.numpy as jnp
from jax import lax
from jax.experimental import pallas as pl
from jax.experimental.pallas import tpu as pltpu


def _round_up(x, m):
    return ((x + m - 1) // m) * m


# ---------------------------------------------------------------------------
# Pallas kernel: gates = [patches|h] @ [W_ih;W_hh] + bias ; LSTM cell update
# Gate column order (arranged by the wrapper): [i, f, o, g]
# ---------------------------------------------------------------------------
def convlstm_kernel(act_ref, cx_ref, w_ref, b_ref, out_ref, *, ch):
    # Single fused MXU contraction: bf16 operands, f32 accumulation.
    gates = jnp.dot(act_ref[...], w_ref[...],
                    preferred_element_type=jnp.float32)
    # Bias added in f32 (VPU broadcast-add, hides under MXU slack).
    gates = gates + b_ref[...]

    # One contiguous sigmoid block (i, f, o) and one tanh block (g).
    sig = jax.nn.sigmoid(gates[:, :3 * ch])
    g = jnp.tanh(gates[:, 3 * ch:4 * ch])

    i = sig[:, 0 * ch:1 * ch]
    f = sig[:, 1 * ch:2 * ch]
    o = sig[:, 2 * ch:3 * ch]

    cy = f * cx_ref[...] + i * g
    hy = o * jnp.tanh(cy)

    # ONE full-width (lane-dense) store: [hy | cy | zero-pad].
    parts = [hy, cy]
    pad = out_ref.shape[-1] - 2 * ch
    if pad > 0:
        parts.append(jnp.zeros((hy.shape[0], pad), jnp.float32))
    out_ref[...] = jnp.concatenate(parts, axis=-1).astype(out_ref.dtype)


# ---------------------------------------------------------------------------
# Wrapper: NCHW in / NCHW out (PyTorch-facing), calls pallas_call
# ---------------------------------------------------------------------------
def conv_lstm_cell(x, hx, cx, w_ih, b_ih, w_hh, b_hh, kernel_size=3, tm=256):
    B, Cin, H, W = x.shape
    Ch = hx.shape[1]
    kh = kw = kernel_size
    Ho, Wo = H - kh + 1, W - kw + 1
    assert hx.shape == (B, Ch, Ho, Wo) and cx.shape == (B, Ch, Ho, Wo)

    M = B * Ho * Wo
    Kih = Cin * kh * kw
    G = 4 * Ch

    # ---- im2col, channels-last, built straight in bf16 --------------------
    x_bf = x.transpose(0, 2, 3, 1).astype(jnp.bfloat16)            # (B,H,W,Cin)
    slabs = [x_bf[:, i:i + Ho, j:j + Wo, :]
             for i in range(kh) for j in range(kw)]
    patches = jnp.concatenate(slabs, axis=-1).reshape(M, Kih)      # cols (ki,kj,c)

    h_bf = hx.transpose(0, 2, 3, 1).reshape(M, Ch).astype(jnp.bfloat16)
    c_flat = cx.transpose(0, 2, 3, 1).reshape(M, Ch).astype(jnp.float32)

    # ---- reorder gates [i,f,g,o] -> [i,f,o,g] (contiguous sigmoid block) ---
    perm = jnp.concatenate([jnp.arange(0, Ch), jnp.arange(Ch, 2 * Ch),
                            jnp.arange(3 * Ch, 4 * Ch), jnp.arange(2 * Ch, 3 * Ch)])
    w_ih_p = w_ih[perm]
    w_hh_p = w_hh[perm]
    bias_p = (b_ih + b_hh)[perm]

    # ---- fused weight [W_ih ; W_hh], contraction dim padded to 128 --------
    # W_ih columns must match im2col (ki,kj,c) ordering.
    w_ih_m = w_ih_p.transpose(0, 2, 3, 1).reshape(G, Kih).T        # (Kih, G)
    w_hh_m = w_hh_p.reshape(G, Ch).T                               # (Ch, G)  1x1 conv
    Kf = Kih + Ch
    Kp = _round_up(Kf, 128)
    Gp = _round_up(G, 128)
    w_fused = jnp.concatenate([w_ih_m, w_hh_m], axis=0).astype(jnp.bfloat16)
    w_fused = jnp.pad(w_fused, ((0, Kp - Kf), (0, Gp - G)))        # (Kp, Gp) bf16

    # Bias stays f32, added post-matmul inside the kernel.
    bias_row = jnp.pad(bias_p.astype(jnp.float32), (0, Gp - G)).reshape(1, Gp)

    # ---- fused activation [patches | h], one concat + one pad, bf16 -------
    M_pad = _round_up(M, tm)
    act = jnp.concatenate([patches, h_bf], axis=-1)                # (M, Kf) bf16
    act = jnp.pad(act, ((0, M_pad - M), (0, Kp - Kf)))             # (M_pad, Kp)

    c_p = jnp.pad(c_flat, ((0, M_pad - M), (0, 0)))                # (M_pad, Ch) f32

    Wout = _round_up(2 * Ch, 128)    # packed [hy | cy | pad] output width
    out_dtype = jnp.float32          # keep cy precision regardless of x.dtype

    out_p = pl.pallas_call(
        functools.partial(convlstm_kernel, ch=Ch),
        out_shape=jax.ShapeDtypeStruct((M_pad, Wout), out_dtype),
        grid_spec=pltpu.PrefetchScalarGridSpec(
            num_scalar_prefetch=0,
            grid=(M_pad // tm,),
            in_specs=[
                pl.BlockSpec((tm, Kp), lambda i: (i, 0)),    # [patches|h]
                pl.BlockSpec((tm, Ch), lambda i: (i, 0)),    # cx
                pl.BlockSpec((Kp, Gp), lambda i: (0, 0)),    # fused weight
                pl.BlockSpec((1, Gp), lambda i: (0, 0)),     # f32 bias row
            ],
            out_specs=pl.BlockSpec((tm, Wout), lambda i: (i, 0)),
        ),
        compiler_params=pltpu.CompilerParams(
            dimension_semantics=("parallel",)),
    )(act, c_p, w_fused, bias_row)

    hy = (out_p[:M, 0 * Ch:1 * Ch].astype(x.dtype)
          .reshape(B, Ho, Wo, Ch).transpose(0, 3, 1, 2))
    cy = out_p[:M, 1 * Ch:2 * Ch].reshape(B, Ho, Wo, Ch).transpose(0, 3, 1, 2)
    return hy, cy


# ---------------------------------------------------------------------------
# Pure-JAX reference (mirrors the PyTorch forward) for correctness check
# ---------------------------------------------------------------------------
def conv_lstm_cell_ref(x, hx, cx, w_ih, b_ih, w_hh, b_hh):
    dn = ('NCHW', 'OIHW', 'NCHW')
    g_ih = lax.conv_general_dilated(x, w_ih, (1, 1), 'VALID',
                                    dimension_numbers=dn) + b_ih[None, :, None, None]
    g_hh = lax.conv_general_dilated(hx, w_hh, (1, 1), 'VALID',
                                    dimension_numbers=dn) + b_hh[None, :, None, None]
    gates = g_ih + g_hh
    i, f, g, o = jnp.split(gates, 4, axis=1)
    i = jax.nn.sigmoid(i); f = jax.nn.sigmoid(f)
    g = jnp.tanh(g); o = jax.nn.sigmoid(o)
    cy = f * cx + i * g
    hy = o * jnp.tanh(cy)
    return hy, cy


if __name__ == "__main__":
    # ConvLSTMCell(input_channels=4, hidden_channels=32, kernel_size=3,
    #              stride=1, padding=0, dilation=1, hidden_kernel_size=1)
    B, Cin, H, W = 2, 4, 16, 16
    Ch, K = 32, 3
    Ho, Wo = H - K + 1, W - K + 1          # valid conv => hidden spatial 14x14
    G = 4 * Ch

    key = jax.random.PRNGKey(0)
    kx, kh_, kc, kw1, kb1, kw2, kb2 = jax.random.split(key, 7)

    x  = jax.random.normal(kx,  (B, Cin, H, W),  dtype=jnp.float32)
    hx = jax.random.normal(kh_, (B, Ch, Ho, Wo), dtype=jnp.float32)
    cx = jax.random.normal(kc,  (B, Ch, Ho, Wo), dtype=jnp.float32)

    # Deterministic parameter init (PyTorch-style uniform(-1/sqrt(fan_in), +))
    fan_ih = Cin * K * K
    fan_hh = Ch * 1 * 1
    b1 = 1.0 / jnp.sqrt(fan_ih)
    b2 = 1.0 / jnp.sqrt(fan_hh)
    w_ih = jax.random.uniform(kw1, (G, Cin, K, K), jnp.float32, -b1, b1)
    b_ih = jax.random.uniform(kb1, (G,),           jnp.float32, -b1, b1)
    w_hh = jax.random.uniform(kw2, (G, Ch, 1, 1),  jnp.float32, -b2, b2)
    b_hh = jax.random.uniform(kb2, (G,),           jnp.float32, -b2, b2)

    hy, cy = conv_lstm_cell(x, hx, cx, w_ih, b_ih, w_hh, b_hh, kernel_size=K)
    jax.block_until_ready((hy, cy))

    hy_ref, cy_ref = conv_lstm_cell_ref(x, hx, cx, w_ih, b_ih, w_hh, b_hh)
    assert hy.shape == (B, Ch, Ho, Wo) and cy.shape == (B, Ch, Ho, Wo)
    # bf16 MXU operands (f32 accumulation, f32 bias add) -> 1e-2 tolerance
    assert jnp.allclose(hy, hy_ref, atol=1e-2, rtol=1e-2), \
        float(jnp.max(jnp.abs(hy - hy_ref)))
    assert jnp.allclose(cy, cy_ref, atol=1e-2, rtol=1e-2), \
        float(jnp.max(jnp.abs(cy - cy_ref)))

    print("KERNEL_OK")
</pallas_src>

<mosaic_0001>
module attributes {stable_mosaic.version = 11 : i64} {
  func.func @convlstm_kernel(%arg0: i32, %arg1: memref<256x128xbf16, #tpu.memory_space<vmem>>, %arg2: memref<256x32xf32, #tpu.memory_space<vmem>>, %arg3: memref<128x128xbf16, #tpu.memory_space<vmem>>, %arg4: memref<1x128xf32, #tpu.memory_space<vmem>>, %arg5: memref<256x128xf32, #tpu.memory_space<vmem>>) attributes {dimension_semantics = [#tpu.dimension_semantics<parallel>], iteration_bounds = array<i64: 2>, scalar_prefetch = 0 : i64, scratch_operands = 0 : i64, tpu.core_type = #tpu.core_type<tc>, window_params = [{transform_indices = @transform_0, window_bounds = array<i64: 256, 128>}, {transform_indices = @transform_1, window_bounds = array<i64: 256, 32>}, {pipeline_mode = #tpu.pipeline_mode<synchronous>, transform_indices = @transform_2, window_bounds = array<i64: 128, 128>}, {pipeline_mode = #tpu.pipeline_mode<synchronous>, transform_indices = @transform_3, window_bounds = array<i64: 1, 128>}, {transform_indices = @transform_4, window_bounds = array<i64: 256, 128>}]} {
    %c0 = arith.constant 0 : index
    %c0_0 = arith.constant 0 : index
    %0 = vector.load %arg1[%c0, %c0_0] : memref<256x128xbf16, #tpu.memory_space<vmem>>, vector<256x128xbf16>
    %c0_1 = arith.constant 0 : index
    %c0_2 = arith.constant 0 : index
    %1 = vector.load %arg3[%c0_1, %c0_2] : memref<128x128xbf16, #tpu.memory_space<vmem>>, vector<128x128xbf16>
    %cst = arith.constant dense<0.000000e+00> : vector<256x128xf32>
    %2 = tpu.matmul %0, %1, %cst {dimension_numbers = #tpu.dot_dimension_numbers<[1], [0], [0], [1], [0, 0, 1, 1], [], []>} : vector<256x128xbf16>, vector<128x128xbf16>, vector<256x128xf32> -> vector<256x128xf32>
    %c0_3 = arith.constant 0 : index
    %c0_4 = arith.constant 0 : index
    %3 = vector.load %arg4[%c0_3, %c0_4] : memref<1x128xf32, #tpu.memory_space<vmem>>, vector<1x128xf32>
    %4 = vector.broadcast %3 : vector<1x128xf32> to vector<256x128xf32>
    %5 = arith.addf %2, %4 : vector<256x128xf32>
    %6 = vector.extract_strided_slice %5 {offsets = [0, 0], sizes = [256, 96], strides = [1, 1]} : vector<256x128xf32> to vector<256x96xf32>
    %7 = arith.negf %6 : vector<256x96xf32>
    %8 = math.exp %7 : vector<256x96xf32>
    %cst_5 = arith.constant 1.000000e+00 : f32
    %9 = vector.broadcast %cst_5 : f32 to vector<256x96xf32>
    %10 = arith.addf %9, %8 : vector<256x96xf32>
    %11 = arith.divf %9, %10 : vector<256x96xf32>
    %12 = vector.extract_strided_slice %5 {offsets = [0, 96], sizes = [256, 32], strides = [1, 1]} : vector<256x128xf32> to vector<256x32xf32>
    %13 = math.tanh %12 : vector<256x32xf32>
    %14 = vector.extract_strided_slice %11 {offsets = [0, 0], sizes = [256, 32], strides = [1, 1]} : vector<256x96xf32> to vector<256x32xf32>
    %15 = vector.extract_strided_slice %11 {offsets = [0, 32], sizes = [256, 32], strides = [1, 1]} : vector<256x96xf32> to vector<256x32xf32>
    %16 = vector.extract_strided_slice %11 {offsets = [0, 64], sizes = [256, 32], strides = [1, 1]} : vector<256x96xf32> to vector<256x32xf32>
    %c0_6 = arith.constant 0 : index
    %c0_7 = arith.constant 0 : index
    %17 = vector.load %arg2[%c0_6, %c0_7] : memref<256x32xf32, #tpu.memory_space<vmem>>, vector<256x32xf32>
    %18 = arith.mulf %15, %17 : vector<256x32xf32>
    %19 = arith.mulf %14, %13 : vector<256x32xf32>
    %20 = arith.addf %18, %19 : vector<256x32xf32>
    %21 = math.tanh %20 : vector<256x32xf32>
    %22 = arith.mulf %16, %21 : vector<256x32xf32>
    %cst_8 = arith.constant 0.000000e+00 : f32
    %23 = vector.broadcast %cst_8 : f32 to vector<256x64xf32>
    %24 = tpu.concatenate %22, %20, %23 in 1 : vector<256x32xf32>, vector<256x32xf32>, vector<256x64xf32> -> vector<256x128xf32>
    %c0_9 = arith.constant 0 : index
    %c0_10 = arith.constant 0 : index
    %25 = vector.load %arg5[%c0_9, %c0_10] : memref<256x128xf32, #tpu.memory_space<vmem>>, vector<256x128xf32>
    tpu.vector_store %arg5[%c0_9, %c0_10], %24 {strides = array<i32>} : memref<256x128xf32, #tpu.memory_space<vmem>>, vector<256x128xf32>,
    return
  }
  func.func @transform_0(%arg0: i32) -> (i32, i32) {
    %c0_i32 = arith.constant 0 : i32
    %c0_i32_0 = arith.constant 0 : i32
    return %arg0, %c0_i32 : i32, i32
  }
  func.func @transform_1(%arg0: i32) -> (i32, i32) {
    %c0_i32 = arith.constant 0 : i32
    %c0_i32_0 = arith.constant 0 : i32
    return %arg0, %c0_i32 : i32, i32
  }
  func.func @transform_2(%arg0: i32) -> (i32, i32) {
    %c0_i32 = arith.constant 0 : i32
    %c0_i32_0 = arith.constant 0 : i32
    %c0_i32_1 = arith.constant 0 : i32
    return %c0_i32, %c0_i32_0 : i32, i32
  }
  func.func @transform_3(%arg0: i32) -> (i32, i32) {
    %c0_i32 = arith.constant 0 : i32
    %c0_i32_0 = arith.constant 0 : i32
    %c0_i32_1 = arith.constant 0 : i32
    return %c0_i32, %c0_i32_0 : i32, i32
  }
  func.func @transform_4(%arg0: i32) -> (i32, i32) {
    %c0_i32 = arith.constant 0 : i32
    %c0_i32_0 = arith.constant 0 : i32
    return %arg0, %c0_i32 : i32, i32
  }
}

</mosaic_0001>

<bundles_post_ra>
// kernel: tpu_custom_call.1
= control target key start
LH: loop header
LB: loop body
LE: loop exit
PB: predicated region body
PF: predicated region fallthrough
CT: control target
= control target key end

     0   :  { %9 = vsyncpa [#allocation3], 0  ;;  %s3395_s0 = inlined_call_operand.vmem [shape: bf16[512,128], index: 0, kind: input, shape index: {}]   ;;  %s3396_s1 = inlined_call_operand.vmem [shape: f32[512,32], index: 1, kind: input, shape index: {}]   ;;  %s3397_s2 = inlined_call_operand.vmem [shape: bf16[128,128], index: 2, kind: input, shape index: {}]   ;;  %s3398_s3 = inlined_call_operand.vmem [shape: f32[1,128], index: 3, kind: input, shape index: {}]   ;;  %s3399_s4 = inlined_call_operand.hbm [shape: f32[512,128], index: 4, kind: output, shape index: {}]  }
   0x1   :  { %11 = vsyncpa [#allocation3 + $0x1], 0  ;;  %s2399_s15 = smov 0   ;;  %s2401_s16 = smov 0  }
   0x2   :  { %s2403_s17 = smov 0   ;;  %s2405_s18 = smov 0  }
   0x3 LB: > { %s2420_s19 = sadd.s32 4294967295, %s2367_s18   ;;  %s1824_s20 = sadd.s32 4294967294, %s2367_s18   ;;  %s2367_s18 = sphi %s2405_s18, %s3457_s18   ;;  %s2363_s17 = sphi %s2403_s17, %s3456_s17   ;;  %s2359_s16 = sphi %s2401_s16, %s3455_s16   ;;  %s2355_s15 = sphi %s2399_s15, %s3454_s15  }
   0x4   : > { %s2424_s21 = sadd.s32 1, %s2367_s18   ;;  %s118_s22 = sadd.s32 1, %s2363_s17 }
   0x5   : > { %s115_s23 = ssub.s32 %s2367_s18, %s2424_s21  ;;  %p128_p0 = scmp.ne.s32.totalorder %s2363_s17, %s2359_s16 }
   0x6   : > { %p116_p1 = scmp.eq.s32.totalorder %s115_s23, 0  ;;  %p129_p2 = scmp.eq.s32.totalorder %s2420_s19, 1 }
   0x7   : > { %p134_p3 = scmp.ne.s32.totalorder %s2359_s16, %s2355_s15  ;;  %p135_p4 = scmp.eq.s32.totalorder %s1824_s20, 1 }
   0x8   : > { %s2435_s24 = scalar_select %p116_p1, %s2363_s17, %s118_s22  }
   0x9   : > { %p2437_p5 = por %p129_p2, %p128_p0  ;;  %p2441_p6 = por %p135_p4, %p134_p3 }
   0xa   : > { %p1827_p7 = scmp.ge.s32.totalorder %s2367_s18, 1  ;;  %p177_p8 = scmp.lt.s32.totalorder %s2367_s18, 3 }
   0xc   : > { %p178_p9 = pnand %p1827_p7, %p177_p8 }
   0xe   : > { %181 = sbr.rel (%p178_p9) target bundleno = 849 (0x351), region = 36 }
  0x13   : > { %v2027_v0 = vld [vmem:[%s3397_s2 + $0x38] sm:$0xff]   ;;  %s1829_s29 = sshll.u32 %s2420_s19, 5  ;;  %v2028_v1 = vld [vmem:[%s3397_s2 + $0x30] sm:$0xff]   ;;  %v2029_v2 = vld [vmem:[%s3397_s2 + $0x28] sm:$0xff]   ;;  %s2369_s9 = smov 32   ;;  %vm1638_vm0 = vcmask 261120  }
  0x14   : > { %p209_p10 = scmp.lt.s32.totalorder %s1829_s29, 63  ;;  %1920 = vmatprep.subr.bf16.mxu0 %v2027_v0  ;;  %1968 = vmatprep.subr.bf16.mxu1 %v2027_v0  ;;  %v2030_v3 = vld [vmem:[%s3397_s2 + $0x20] sm:$0xff]   ;;  %v2031_v6 = vld [vmem:[%s3397_s2 + $0x18] sm:$0xff]   ;;  %v2032_v7 = vld [vmem:[%s3397_s2 + $0x10] sm:$0xff]   ;;  %s2370_s12 = smov 64   ;;  %vm1671_vm1 = vcmask 523264  }
  0x15   : > { %1921 = vmatpush3.bf16.msra.mxu0 %v2027_v0  ;;  %1976 = vmatpush3.bf16.msra.mxu1 %v2027_v0  ;;  %v2033_v8 = vld [vmem:[%s3397_s2 + $0x8] sm:$0xff]   ;;  %v2034_v9 = vld [vmem:[%s3397_s2] sm:$0xff]   ;;  %s205_s13 = sand.u32 1, %s2359_s16   ;;  %s1895_s22 = sshll.u32 %s2420_s19, 12 }
  0x16   : > { %s3459_s29 = smov (!%p209_p10, %s1829_s29), 63  ;;  %1922 = vmatprep.subr.bf16.mxu0 %v2028_v1  ;;  %1969 = vmatprep.subr.bf16.mxu1 %v2028_v1  ;;  %v2569_v56 = vld [vmem:[%s3398_s3] ss:$0 sm:$0xff]  ;;  %s1828_s14 = sshll.u32 %s205_s13, 8 }
  0x17   : > { %s1830_s8 = sshll.u32 %s3459_s29, 2  ;;  %s1832_s27 = sshll.u32 %s3459_s29, 3 }
  0x18   : > { %s2463_s11 = scalar_lea.vmem %s3395_s0, %s1830_s8  ;;  %s2483_s7 = scalar_lea.vmem %s3396_s1, %s1832_s27 }
  0x19   : > { %1923 = vmatpush3.bf16.msra.mxu0 %v2028_v1  ;;  %1977 = vmatpush3.bf16.msra.mxu1 %v2028_v1  ;;  %v2035_v4 = vld [vmem:[%s2463_s11] sm:$0xff]   ;;  %v808_v10 = vld [vmem:[%s2483_s7 + $0x10] sm:$0xff]  ;;  %v809_v12 = vld [vmem:[%s2483_s7 + $0x18] sm:$0xff]  ;;  %s3217_s20 = scalar_lea.vmem [#allocation2], %s1828_s14  ;;  %s3345_s30 = scalar_lea.hbm %s3399_s4, %s1895_s22 }
  0x1a   : > { %1924 = vmatprep.subr.bf16.mxu0 %v2029_v2  ;;  %1970 = vmatprep.subr.bf16.mxu1 %v2029_v2  ;;  %v2036_v5 = vld [vmem:[%s2463_s11 + $0x40] sm:$0xff]   ;;  %v807_v13 = vld [vmem:[%s2483_s7 + $0x8] sm:$0xff]  ;;  %v2039_v18 = vld [vmem:[%s2463_s11 + $0x10] sm:$0xff]   ;;  %s1750_s23 = sshll.u32 %s3217_s20, 4  ;;  %s3355_s19 = scalar_lea.sflag [#allocation3], %s205_s13  ;;  %s3347_s23 = int_to_ptr.vmem [resolvable:$true] %s1750_s23 }
  0x1b   : > { %1936 = vmatprep.mubr.bf16.mxu0 %v2035_v4  ;;  %1952 = vmatprep.mubr.bf16.mxu1 %v2036_v5  ;;  %v806_v11 = vld [vmem:[%s2483_s7] sm:$0xff]  ;;  %v2037_v14 = vld [vmem:[%s2463_s11 + $0x8] sm:$0xff]   ;;  %v2041_v19 = vld [vmem:[%s2463_s11 + $0x50] sm:$0xff]   ;;  %s2307_s5 = scalar_lea.vmem %s3347_s23, 4096  ;;  %s2371_s6 = smov [#allocation2]  }
  0x1c   : > { %874 = vrot.lane.b32.xlu1 %v808_v10, %s2369_s9  ;;  %870 = vrot.lane.b32.xlu0 %v806_v11, %s2369_s9  ;;  %v2038_v15 = vld [vmem:[%s2463_s11 + $0x48] sm:$0xff]   ;;  %v810_v17 = vld [vmem:[%s2483_s7 + $0x20] sm:$0xff]  ;;  %p2308_p11 = scmp.ne.s32.totalorder %s3347_s23, %s2307_s5 }
  0x1d   : > { %1925 = vmatpush3.bf16.msra.mxu0 %v2029_v2  ;;  %1978 = vmatpush3.bf16.msra.mxu1 %v2029_v2  ;;  %v811_v16 = vld [vmem:[%s2483_s7 + $0x28] sm:$0xff]  ;;  %v813_v20 = vld [vmem:[%s2483_s7 + $0x38] sm:$0xff]  ;;  %v812_v21 = vld [vmem:[%s2483_s7 + $0x30] sm:$0xff] }
  0x1e   : > { %1926 = vmatprep.subr.bf16.mxu0 %v2030_v3  ;;  %1971 = vmatprep.subr.bf16.mxu1 %v2030_v3  ;;  %v2040_v22 = vld [vmem:[%s2463_s11 + $0x18] sm:$0xff]   ;;  %v815_v24 = vld [vmem:[%s2483_s7 + $0x48] sm:$0xff]  ;;  %v814_v25 = vld [vmem:[%s2483_s7 + $0x40] sm:$0xff]  ;;  %p2309_p12 = pnand %p2308_p11, %p2437_p5 }
  0x1f   : > { %v2042_v23 = vld [vmem:[%s2463_s11 + $0x58] sm:$0xff]   ;;  %v2043_v26 = vld [vmem:[%s2463_s11 + $0x20] sm:$0xff]   ;;  %v816_v29 = vld [vmem:[%s2483_s7 + $0x50] sm:$0xff] }
  0x20   : > { %876 = vrot.lane.b32.xlu1 %v809_v12, %s2369_s9  ;;  %872 = vrot.lane.b32.xlu0 %v807_v13, %s2369_s9  ;;  %v2045_v27 = vld [vmem:[%s2463_s11 + $0x60] sm:$0xff]   ;;  %v817_v28 = vld [vmem:[%s2483_s7 + $0x58] sm:$0xff]  ;;  %p2310_p13 = pneg %p2309_p12 }
  0x21   : > { %1927 = vmatpush3.bf16.msra.mxu0 %v2030_v3  ;;  %1979 = vmatpush3.bf16.msra.mxu1 %v2030_v3  ;;  %v2044_v30 = vld [vmem:[%s2463_s11 + $0x28] sm:$0xff]   ;;  %v818_v33 = vld [vmem:[%s2483_s7 + $0x60] sm:$0xff]  ;;  %v2047_v34 = vld [vmem:[%s2463_s11 + $0x30] sm:$0xff]  }
  0x22   : > { %1928 = vmatprep.subr.bf16.mxu0 %v2031_v6  ;;  %1972 = vmatprep.subr.bf16.mxu1 %v2031_v6  ;;  %v2046_v31 = vld [vmem:[%s2463_s11 + $0x68] sm:$0xff]   ;;  %v2049_v35 = vld [vmem:[%s2463_s11 + $0x70] sm:$0xff]   ;;  %v821_v36 = vld [vmem:[%s2483_s7 + $0x78] sm:$0xff] }
  0x23   : > { %v819_v32 = vld [vmem:[%s2483_s7 + $0x68] sm:$0xff]  ;;  %v820_v37 = vld [vmem:[%s2483_s7 + $0x70] sm:$0xff]  ;;  %v2048_v38 = vld [vmem:[%s2463_s11 + $0x38] sm:$0xff]  }
  0x24   : > { %880 = vrot.lane.b32.xlu1 %v811_v16, %s2369_s9  ;;  %878 = vrot.lane.b32.xlu0 %v810_v17, %s2369_s9  ;;  %v2050_v39 = vld [vmem:[%s2463_s11 + $0x78] sm:$0xff]   ;;  %v823_v40 = vld [vmem:[%s2483_s7 + $0x88] sm:$0xff] }
  0x25   : > { %1929 = vmatpush3.bf16.msra.mxu0 %v2031_v6  ;;  %1980 = vmatpush3.bf16.msra.mxu1 %v2031_v6  ;;  %v822_v41 = vld [vmem:[%s2483_s7 + $0x80] sm:$0xff]  ;;  %v825_v42 = vld [vmem:[%s2483_s7 + $0x98] sm:$0xff]  ;;  %v824_v43 = vld [vmem:[%s2483_s7 + $0x90] sm:$0xff] }
  0x26   : > { %1930 = vmatprep.subr.bf16.mxu0 %v2032_v7  ;;  %1973 = vmatprep.subr.bf16.mxu1 %v2032_v7  ;;  %v827_v44 = vld [vmem:[%s2483_s7 + $0xa8] sm:$0xff]  ;;  %v826_v45 = vld [vmem:[%s2483_s7 + $0xa0] sm:$0xff]  ;;  %v829_v46 = vld [vmem:[%s2483_s7 + $0xb8] sm:$0xff] }
  0x27   : > { %v828_v47 = vld [vmem:[%s2483_s7 + $0xb0] sm:$0xff]  ;;  %v831_v48 = vld [vmem:[%s2483_s7 + $0xc8] sm:$0xff]  ;;  %v830_v49 = vld [vmem:[%s2483_s7 + $0xc0] sm:$0xff] }
  0x28   : > { %884 = vrot.lane.b32.xlu1 %v813_v20, %s2369_s9  ;;  %882 = vrot.lane.b32.xlu0 %v812_v21, %s2369_s9  ;;  %v833_v50 = vld [vmem:[%s2483_s7 + $0xd8] sm:$0xff]  ;;  %v832_v51 = vld [vmem:[%s2483_s7 + $0xd0] sm:$0xff] }
  0x29   : > { %1931 = vmatpush3.bf16.msra.mxu0 %v2032_v7  ;;  %1981 = vmatpush3.bf16.msra.mxu1 %v2032_v7  ;;  %v835_v52 = vld [vmem:[%s2483_s7 + $0xe8] sm:$0xff]  ;;  %v834_v53 = vld [vmem:[%s2483_s7 + $0xe0] sm:$0xff]  ;;  %v837_v54 = vld [vmem:[%s2483_s7 + $0xf8] sm:$0xff] }
  0x2a   : > { %1932 = vmatprep.subr.bf16.mxu0 %v2033_v8  ;;  %1974 = vmatprep.subr.bf16.mxu1 %v2033_v8  ;;  %v836_v55 = vld [vmem:[%s2483_s7 + $0xf0] sm:$0xff]  ;;  %s2311_s7 = sshll.u32 %s2371_s6, 4  ;;  %s2312_s7 = int_to_ptr.vmem [resolvable:$false] %s2311_s7 }
  0x2b   : > { %s2313_s29 = scalar_lea.vmem %s2312_s7, 8192  ;;  %p2314_p0 = scmp.lt.s32.totalorder %s3347_s23, %s2312_s7 }
  0x2c   : > { %888 = vrot.lane.b32.xlu1 %v815_v24, %s2369_s9  ;;  %886 = vrot.lane.b32.xlu0 %v814_v25, %s2369_s9  ;;  %p2315_p1 = scmp.lt.s32.totalorder %s2313_s29, %s2307_s5 }
  0x2d   : > { %1933 = vmatpush3.bf16.msra.mxu0 %v2033_v8  ;;  %1982 = vmatpush3.bf16.msra.mxu1 %v2033_v8 }
  0x2e   : > { %1934 = vmatprep.subr.bf16.mxu0 %v2034_v9  ;;  %1975 = vmatprep.subr.bf16.mxu1 %v2034_v9  ;;  %p2316_p2 = por %p2315_p1, %p2314_p0 }
  0x30   : > { %892 = vrot.lane.b32.xlu1 %v817_v28, %s2369_s9  ;;  %890 = vrot.lane.b32.xlu0 %v816_v29, %s2369_s9  ;;  %p2317_p3 = pnand %p2316_p2, %p2310_p13 }
  0x31   : > { %1935 = vmatpush3.bf16.msra.mxu0 %v2034_v9  ;;  %1983 = vmatpush3.bf16.msra.mxu1 %v2034_v9 }
  0x34   : > { %1937 = vmatmul.mubr.bf16.vlgmr.msra.gmra.mxu0 %v2037_v14  ;;  %1953 = vmatmul.mubr.bf16.vlgmr.msra.gmra.mxu1 %v2038_v15 }
  0x35   : > { %1940 = vmatprep.mubr.bf16.mxu0 %v2039_v18  ;;  %1956 = vmatprep.mubr.bf16.mxu1 %v2041_v19 }
  0x36   : > { %896 = vrot.lane.b32.xlu1 %v819_v32, %s2369_s9  ;;  %894 = vrot.lane.b32.xlu0 %v818_v33, %s2369_s9 }
  0x3a   : > { %900 = vrot.lane.b32.xlu1 %v821_v36, %s2369_s9  ;;  %898 = vrot.lane.b32.xlu0 %v820_v37, %s2369_s9 }
  0x3c   : > { %1941 = vmatmul.mubr.bf16.gmra.mxu0 %v2040_v22  ;;  %1957 = vmatmul.mubr.bf16.gmra.mxu1 %v2042_v23 }
  0x3d   : > { %1944 = vmatprep.mubr.bf16.mxu0 %v2043_v26  ;;  %1960 = vmatprep.mubr.bf16.mxu1 %v2045_v27 }
  0x3e   : > { %904 = vrot.lane.b32.xlu1 %v823_v40, %s2369_s9  ;;  %902 = vrot.lane.b32.xlu0 %v822_v41, %s2369_s9 }
  0x42   : > { %908 = vrot.lane.b32.xlu1 %v825_v42, %s2369_s9  ;;  %906 = vrot.lane.b32.xlu0 %v824_v43, %s2369_s9 }
  0x44   : > { %1945 = vmatmul.mubr.bf16.gmra.mxu0 %v2044_v30  ;;  %1961 = vmatmul.mubr.bf16.gmra.mxu1 %v2046_v31 }
  0x45   : > { %1948 = vmatprep.mubr.bf16.mxu0 %v2047_v34  ;;  %1964 = vmatprep.mubr.bf16.mxu1 %v2049_v35 }
  0x46   : > { %912 = vrot.lane.b32.xlu1 %v827_v44, %s2369_s9  ;;  %910 = vrot.lane.b32.xlu0 %v826_v45, %s2369_s9 }
  0x4a   : > { %916 = vrot.lane.b32.xlu1 %v829_v46, %s2369_s9  ;;  %914 = vrot.lane.b32.xlu0 %v828_v47, %s2369_s9 }
  0x4c   : > { %1949 = vmatmul.mubr.bf16.gmra.mxu0 %v2048_v38  ;;  %1965 = vmatmul.mubr.bf16.gmra.mxu1 %v2050_v39 }
  0x4e   : > { %920 = vrot.lane.b32.xlu1 %v831_v48, %s2369_s9  ;;  %918 = vrot.lane.b32.xlu0 %v830_v49, %s2369_s9 }
  0x52   : > { %924 = vrot.lane.b32.xlu1 %v833_v50, %s2369_s9  ;;  %922 = vrot.lane.b32.xlu0 %v832_v51, %s2369_s9 }
  0x56   : > { %928 = vrot.lane.b32.xlu1 %v835_v52, %s2369_s9  ;;  %926 = vrot.lane.b32.xlu0 %v834_v53, %s2369_s9 }
  0x5a   : > { %932 = vrot.lane.b32.xlu1 %v837_v54, %s2369_s9  ;;  %930 = vrot.lane.b32.xlu0 %v836_v55, %s2369_s9 }
  0x8e   : > { %v2639_v34 = vpop.permute.xlu0 %870  ;;  %v2657_v45 = vpop.permute.xlu1 %874 }
  0x92   : > { %v2651_v40 = vpop.permute.xlu0 %872  ;;  %v2672_v52 = vpop.permute.xlu1 %876 }
  0x96   : > { %v2664_v49 = vpop.permute.xlu0 %878 }
  0xf4   : > { %v1938_v57 = vpop.f32.mrf.mxu0  ;;  %v1954_v58 = vpop.f32.mrf.mxu1 }
  0xf5   : > { %v2572_v59 = vadd.f32 %v1938_v57, %v2569_v56  ;;  %v2575_v60 = vadd.f32 %v1954_v58, %v2569_v56  ;;  %v2679_v57 = vpop.permute.xlu0 %882 }
  0xf6   : > { %v455_v61 = vpop.f32.mrf.mxu0  ;;  %v519_v62 = vpop.f32.mrf.mxu1 }
  0xf7   : > { %2051 = vtanh.f32 %v2572_v59  ;;  %v2580_v0 = vadd.f32 %v2569_v56, %v455_v61  ;;  %v2587_v3 = vadd.f32 %v2569_v56, %v519_v62 }
  0xf8   : > { %2053 = vtanh.f32 %v2575_v60  ;;  %v1939_v63 = vpop.f32.mrf.mxu0  ;;  %v1955_v2 = vpop.f32.mrf.mxu1 }
  0xf9   : > { %v2583_v1 = vadd.f32 %v1939_v63, %v2569_v56  ;;  %2055 = vtanh.f32 %v2580_v0  ;;  %v2591_v4 = vadd.f32 %v1955_v2, %v2569_v56  ;;  %v2685_v2 = vpop.permute.xlu1 %880 }
  0xfa   : > { %v458_v5 = vpop.f32.mrf.mxu0  ;;  %v522_v10 = vpop.f32.mrf.mxu1 }
  0xfb   : > { %2057 = vtanh.f32 %v2583_v1  ;;  %v2595_v6 = vadd.f32 %v2569_v56, %v458_v5  ;;  %v2604_v12 = vadd.f32 %v2569_v56, %v522_v10  ;;  %v2693_v10 = vpop.permute.xlu0 %886 }
  0xfc   : > { %2059 = vtanh.f32 %v2587_v3  ;;  %v1942_v7 = vpop.f32.mrf.mxu0  ;;  %v1958_v20 = vpop.f32.mrf.mxu1 }
  0xfd   : > { %2061 = vtanh.f32 %v2591_v4  ;;  %v2599_v9 = vadd.f32 %v1942_v7, %v2569_v56  ;;  %v2617_v21 = vadd.f32 %v1958_v20, %v2569_v56 }
  0xfe   : > { %2063 = vtanh.f32 %v2595_v6  ;;  %v471_v13 = vpop.f32.mrf.mxu0  ;;  %v535_v24 = vpop.f32.mrf.mxu1 }
  0xff   : > { %2065 = vtanh.f32 %v2599_v9  ;;  %v2621_v25 = vadd.f32 %v2569_v56, %v471_v13  ;;  %v2627_v27 = vadd.f32 %v2569_v56, %v535_v24  ;;  %v2707_v20 = vpop.permute.xlu0 %890 }
 0x100   : > { %2067 = vtanh.f32 %v2604_v12  ;;  %v1943_v16 = vpop.f32.mrf.mxu0  ;;  %v1959_v28 = vpop.f32.mrf.mxu1 }
 0x101   : > { %v2611_v17 = vadd.f32 %v1943_v16, %v2569_v56  ;;  %v2631_v29 = vadd.f32 %v1959_v28, %v2569_v56  ;;  %v2699_v16 = vpop.permute.xlu1 %884 }
 0x102   : > { %v474_v30 = vpop.f32.mrf.mxu0  ;;  %v538_v35 = vpop.f32.mrf.mxu1 }
 0x103   : > { %2069 = vtanh.f32 %v2611_v17  ;;  %v2636_v32 = vadd.f32 %v2569_v56, %v474_v30  ;;  %v2647_v38 = vadd.f32 %v2569_v56, %v538_v35 }
 0x104   : > { %v2052_v8 = vpop.eup %2051  ;;  %2071 = vtanh.f32 %v2617_v21  ;;  %v1946_v31 = vpop.f32.mrf.mxu0 }
 0x105   : > { %1034 = vrot.lane.b32.xlu0 %v2052_v8, %s2369_s9  ;;  %v2054_v11 = vpop.eup %2053  ;;  %2073 = vtanh.f32 %v2621_v25  ;;  %v2642_v36 = vadd.f32 %v1946_v31, %v2569_v56  ;;  %v1962_v44 = vpop.f32.mrf.mxu1 }
 0x106   : > { %v2056_v14 = vpop.eup %2055  ;;  %2075 = vtanh.f32 %v2627_v27  ;;  %v487_v37 = vpop.f32.mrf.mxu0  ;;  %v2660_v46 = vadd.f32 %v1962_v44, %v2569_v56 }
 0x107   : > { %2077 = vtanh.f32 %v2631_v29  ;;  %v2667_v50 = vadd.f32 %v2569_v56, %v487_v37  ;;  %v551_v51 = vpop.f32.mrf.mxu1  ;;  %v2714_v24 = vpop.permute.xlu1 %888 }
 0x108   : > { %v2058_v15 = vpop.eup %2057  ;;  %2079 = vtanh.f32 %v2636_v32  ;;  %v1947_v41 = vpop.f32.mrf.mxu0  ;;  %v2676_v55 = vadd.f32 %v2569_v56, %v551_v51 }
 0x109   : > { %1066 = vrot.lane.b32.xlu0 %v2054_v11, %s2369_s9  ;;  %1036 = vrot.lane.b32.xlu1 %v2058_v15, %s2369_s9  ;;  %v2060_v18 = vpop.eup %2059  ;;  %2081 = vtanh.f32 %v2642_v36  ;;  %v2655_v42 = vadd.f32 %v1947_v41, %v2569_v56  ;;  %v1963_v58 = vpop.f32.mrf.mxu1 }
 0x10a   : > { %v2062_v19 = vpop.eup %2061  ;;  %2083 = vtanh.f32 %v2647_v38  ;;  %v2683_v61 = vadd.f32 %v1963_v58, %v2569_v56  ;;  %v490_v63 = vpop.f32.mrf.mxu0 }
 0x10b   : > { %v2064_v22 = vpop.eup %2063  ;;  %2085 = vtanh.f32 %v2655_v42  ;;  %v2690_v7 = vadd.f32 %v2569_v56, %v490_v63  ;;  %v554_v11 = vpop.f32.mrf.mxu1 }
 0x10c   : > { %v2066_v23 = vpop.eup %2065  ;;  %2087 = vtanh.f32 %v2660_v46  ;;  %v1950_v5 = vpop.f32.mrf.mxu0 }
 0x10d   : > { %1030 = vrot.lane.b32.xlu0 %v2056_v14, %s2369_s9  ;;  %1068 = vrot.lane.b32.xlu1 %v2062_v19, %s2369_s9  ;;  %v2068_v26 = vpop.eup %2067  ;;  %2089 = vtanh.f32 %v2667_v50  ;;  %v2696_v13 = vadd.f32 %v1950_v5, %v2569_v56 }
 0x10e   : > { %2091 = vtanh.f32 %v2676_v55  ;;  %v503_v15 = vpop.f32.mrf.mxu0 }
 0x10f   : > { %2093 = vtanh.f32 %v2683_v61  ;;  %v2725_v35 = vadd.f32 %v2569_v56, %v503_v15 }
 0x110   : > { %v2070_v33 = vpop.eup %2069  ;;  %2095 = vtanh.f32 %v2690_v7 }
 0x111   : > { %1062 = vrot.lane.b32.xlu0 %v2060_v18, %s2369_s9  ;;  %1032 = vrot.lane.b32.xlu1 %v2064_v22, %s2369_s9  ;;  %v2072_v39 = vpop.eup %2071  ;;  %v2703_v18 = vadd.f32 %v2569_v56, %v554_v11  ;;  %2097 = vtanh.f32 %v2696_v13  ;;  %v1951_v22 = vpop.f32.mrf.mxu0  ;;  %v1860_v11 = vmul.f32 -1.442695, %v2572_v59 }
 0x112   : > { %v2074_v43 = vpop.eup %2073 }
 0x113   : > { %v2076_v47 = vpop.eup %2075  ;;  %2099 = vtanh.f32 %v2703_v18 }
 0x114   : > { %v2078_v48 = vpop.eup %2077 }
 0x115   : > { %1042 = vrot.lane.b32.xlu0 %v2066_v23, %s2369_s9  ;;  %1064 = vrot.lane.b32.xlu1 %v2068_v26, %s2369_s9  ;;  %v2080_v53 = vpop.eup %2079  ;;  %v2711_v23 = vadd.f32 %v1951_v22, %v2569_v56  ;;  %v1966_v26 = vpop.f32.mrf.mxu1 }
 0x116   : > { %v2082_v54 = vpop.eup %2081  ;;  %v2717_v30 = vadd.f32 %v1966_v26, %v2569_v56 }
 0x117   : > { %v2084_v62 = vpop.eup %2083  ;;  %2101 = vtanh.f32 %v2711_v23  ;;  %v567_v37 = vpop.f32.mrf.mxu1 }
 0x118   : > { %v2086_v8 = vpop.eup %2085  ;;  %2103 = vtanh.f32 %v2717_v30 }
 0x119   : > { %1044 = vrot.lane.b32.xlu1 %v2070_v33, %s2369_s9  ;;  %1074 = vrot.lane.b32.xlu0 %v2072_v39, %s2369_s9  ;;  %v2088_v14 = vpop.eup %2087  ;;  %v2721_v33 = vpop.permute.xlu0 %894  ;;  %2105 = vtanh.f32 %v2725_v35 }
 0x11a   : > { %v2090_v19 = vpop.eup %2089  ;;  %3416 = vst [vmem:[#allocation5_spill] sm:$0xff] %v2721_v33  ;;  %v2728_v39 = vpop.permute.xlu1 %892 }
 0x11b   : > { %v2092_v28 = vpop.eup %2091 }
 0x11c   : > { %v2094_v31 = vpop.eup %2093 }
 0x11d   : > { %1038 = vrot.lane.b32.xlu0 %v2074_v43, %s2369_s9  ;;  %1076 = vrot.lane.b32.xlu1 %v2078_v48, %s2369_s9  ;;  %v2096_v41 = vpop.eup %2095  ;;  %v2731_v44 = vpop.permute.xlu0 %898 }
 0x11e   : > { %v2098_v43 = vpop.eup %2097  ;;  %v1967_v48 = vpop.f32.mrf.mxu1 }
 0x11f   : > { %v2738_v51 = vadd.f32 %v1967_v48, %v2569_v56  ;;  %v2741_v58 = vpop.permute.xlu1 %896 }
 0x120   : > { %3417 = vst [vmem:[#allocation6_spill] sm:$0xff] %v2741_v58 }
 0x121   : > { %1070 = vrot.lane.b32.xlu0 %v2076_v47, %s2369_s9  ;;  %1040 = vrot.lane.b32.xlu1 %v2080_v53, %s2369_s9  ;;  %v2735_v47 = vadd.f32 %v2569_v56, %v567_v37  ;;  %v2100_v53 = vpop.eup %2099  ;;  %v2749_v5 = vpop.permute.xlu0 %902 }
 0x123   : > { %2107 = vtanh.f32 %v2735_v47  ;;  %v2753_v15 = vpop.permute.xlu1 %900 }
 0x124   : > { %2109 = vtanh.f32 %v2738_v51  ;;  %v2102_v63 = vpop.eup %2101  ;;  %3418 = vst [vmem:[#allocation7_spill] sm:$0xff] %v2753_v15 }
 0x125   : > { %1050 = vrot.lane.b32.xlu0 %v2082_v54, %s2369_s9  ;;  %1072 = vrot.lane.b32.xlu1 %v2084_v62, %s2369_s9  ;;  %v506_v54 = vpop.f32.mrf.mxu0  ;;  %v2760_v22 = vpop.permute.xlu0 %906 }
 0x126   : > { %v2746_v62 = vadd.f32 %v2569_v56, %v506_v54  ;;  %v1877_v54 = vmul.f32 -1.442695, %v2591_v4 }
 0x127   : > { %v2765_v59 = vpop.permute.xlu1 %904 }
 0x128   : > { %2111 = vtanh.f32 %v2746_v62 }
 0x129   : > { %1052 = vrot.lane.b32.xlu1 %v2086_v8, %s2369_s9  ;;  %1082 = vrot.lane.b32.xlu0 %v2088_v14, %s2369_s9  ;;  %v570_v8 = vpop.f32.mrf.mxu1  ;;  %v2104_v14 = vpop.eup %2103  ;;  %2113 = vpow2.f32 %v1860_v11 }
 0x12a   : > { %v2106_v26 = vpop.eup %2105 }
 0x12b   : > { %v2774_v48 = vpop.permute.xlu1 %908 }
 0x12d   : > { %1046 = vrot.lane.b32.xlu0 %v2090_v19, %s2369_s9  ;;  %1084 = vrot.lane.b32.xlu1 %v2094_v31, %s2369_s9  ;;  %v2757_v19 = vadd.f32 %v2569_v56, %v570_v8  ;;  %v2767_v31 = vpop.permute.xlu0 %910  ;;  %v1858_v56 = vmul.f32 -1.442695, %v2580_v0 }
 0x12f   : > { %2115 = vtanh.f32 %v2757_v19  ;;  %v2781_v8 = vpop.permute.xlu1 %912 }
 0x130   : > { %v2108_v37 = vpop.eup %2107 }
 0x131   : > { %1078 = vrot.lane.b32.xlu0 %v2092_v28, %s2369_s9  ;;  %1048 = vrot.lane.b32.xlu1 %v2096_v41, %s2369_s9  ;;  %v1876_v28 = vmul.f32 -1.442695, %v2575_v60  ;;  %v2110_v41 = vpop.eup %2109  ;;  %v1874_v60 = vmul.f32 -1.442695, %v2587_v3  ;;  %v1864_v3 = vmul.f32 -1.442695, %v2599_v9 }
 0x133   : > { %2117 = vpow2.f32 %v1876_v28  ;;  %v1875_v28 = vmul.f32 -1.442695, %v2604_v12 }
 0x134   : > { %2119 = vpow2.f32 %v1858_v56 }
 0x135   : > { %1058 = vrot.lane.b32.xlu0 %v2098_v43, %s2369_s9  ;;  %1080 = vrot.lane.b32.xlu1 %v2100_v53, %s2369_s9  ;;  %v1861_v43 = vmul.f32 -1.442695, %v2583_v1  ;;  %v2112_v53 = vpop.eup %2111  ;;  %v1859_v1 = vmul.f32 -1.442695, %v2595_v6 }
 0x136   : > { %v2114_v0 = vpop.eup %2113 }
 0x137   : > { %2121 = vpow2.f32 %v1861_v43 }
 0x138   : > { %2123 = vpow2.f32 %v1874_v60  ;;  %v1865_v60 = vmul.f32 -1.442695, %v2611_v17 }
 0x139   : > { %1060 = vrot.lane.b32.xlu1 %v2102_v63, %s2369_s9  ;;  %1090 = vrot.lane.b32.xlu0 %v2104_v14, %s2369_s9  ;;  %v2777_v63 = vpop.permute.xlu0 %914  ;;  %2125 = vpow2.f32 %v1877_v54 }
 0x13a   : > { %2127 = vpow2.f32 %v1859_v1 }
 0x13b   : > { %2129 = vpow2.f32 %v1864_v3 }
 0x13c   : > { %v2116_v11 = vpop.eup %2115 }
 0x13d   : > { %1054 = vrot.lane.b32.xlu0 %v2106_v26, %s2369_s9  ;;  %1092 = vrot.lane.b32.xlu1 %v2110_v41, %s2369_s9  ;;  %v2784_v14 = vpop.permute.xlu0 %918  ;;  %v680_v26 = vadd.f32 1.0, %v2114_v0 }
 0x13f   : > { %2131 = vrcp.f32 %v680_v26 }
 0x140   : > { %v2118_v4 = vpop.eup %2117  ;;  %2133 = vpow2.f32 %v1875_v28 }
 0x141   : > { %1086 = vrot.lane.b32.xlu0 %v2108_v37, %s2369_s9  ;;  %1056 = vrot.lane.b32.xlu1 %v2112_v53, %s2369_s9  ;;  %v2788_v37 = vpop.permute.xlu1 %916  ;;  %v2790_v56 = vpop.permute.xlu0 %922  ;;  %v696_v6 = vadd.f32 1.0, %v2118_v4 }
 0x142   : > { %v2120_v41 = vpop.eup %2119 }
 0x143   : > { %2135 = vrcp.f32 %v696_v6  ;;  %v678_v54 = vadd.f32 1.0, %v2120_v41 }
 0x144   : > { %v2122_v43 = vpop.eup %2121  ;;  %2137 = vpow2.f32 %v1865_v60 }
 0x145   : > { %1088 = vrot.lane.b32.xlu1 %v2116_v11, %s2369_s9  ;;  %v2792_v9 = vpop.permute.xlu1 %920  ;;  %v2795_v53 = vpop.permute.xlu0 %926  ;;  %v681_v12 = vadd.f32 1.0, %v2122_v43  ;;  %v1880_v11 = vmul.f32 -1.442695, %v2617_v21  ;;  %2139 = vrcp.f32 %v678_v54 }
 0x146   : > { %3419 = vst [vmem:[#allocation8_spill] sm:$0xff] %v2795_v53  ;;  %v2124_v0 = vpop.eup %2123  ;;  %v1862_v53 = vmul.f32 -1.442695, %v2621_v25 }
 0x147   : > { %v2126_v1 = vpop.eup %2125  ;;  %v694_v3 = vadd.f32 1.0, %v2124_v0  ;;  %2141 = vrcp.f32 %v681_v12  ;;  %v1878_v0 = vmul.f32 -1.442695, %v2627_v27 }
 0x148   : > { %v2128_v4 = vpop.eup %2127  ;;  %v697_v28 = vadd.f32 1.0, %v2126_v1  ;;  %2143 = vpow2.f32 %v1880_v11  ;;  %v1881_v1 = vmul.f32 -1.442695, %v2631_v29 }
 0x149   : > { %v2798_v26 = vpop.permute.xlu1 %924  ;;  %v2800_v58 = vpop.permute.xlu0 %930  ;;  %2145 = vrcp.f32 %v694_v3  ;;  %v679_v6 = vadd.f32 1.0, %v2128_v4  ;;  %v1863_v4 = vmul.f32 -1.442695, %v2636_v32  ;;  %v1879_v32 = vmul.f32 -1.442695, %v2647_v38 }
 0x14a   : > { %3420 = vst [vmem:[#allocation9_spill] sm:$0xff] %v2800_v58  ;;  %v2130_v17 = vpop.eup %2129  ;;  %2147 = vrcp.f32 %v697_v28  ;;  %v1869_v38 = vmul.f32 -1.442695, %v2655_v42 }
 0x14b   : > { %v684_v21 = vadd.f32 1.0, %v2130_v17  ;;  %2149 = vpow2.f32 %v1862_v53  ;;  %v1868_v53 = vmul.f32 -1.442695, %v2642_v36 }
 0x14c   : > { %v2805_v43 = vpop.eup %2131  ;;  %2151 = vrcp.f32 %v679_v6 }
 0x14d   : > { %v2803_v41 = vpop.permute.xlu1 %928  ;;  %v2134_v54 = vpop.eup %2133  ;;  %2153 = vrcp.f32 %v684_v21 }
 0x14e   : > { %3421 = vst [vmem:[#allocation10_spill] sm:$0xff] %v2803_v41  ;;  %v695_v11 = vadd.f32 1.0, %v2134_v54  ;;  %2155 = vpow2.f32 %v1878_v0 }
 0x14f   : > { %2157 = vpow2.f32 %v1881_v1 }
 0x150   : > { %v2811_v25 = vpop.eup %2135  ;;  %2159 = vrcp.f32 %v695_v11 }
 0x151   : > { %v2814_v28 = vpop.permute.xlu1 %932  ;;  %v2138_v17 = vpop.eup %2137  ;;  %2161 = vpow2.f32 %v1863_v4 }
 0x152   : > { %3422 = vst [vmem:[#allocation11_spill] sm:$0xff] %v2814_v28  ;;  %v2819_v29 = vpop.eup %2139  ;;  %v685_v0 = vadd.f32 1.0, %v2138_v17  ;;  %2163 = vpow2.f32 %v1868_v53 }
 0x153   : > { %2165 = vpow2.f32 %v1879_v32 }
 0x154   : > { %2167 = vrcp.f32 %v685_v0 }
 0x155   : > { %2169 = vpow2.f32 %v1869_v38 }
 0x177   : > { %v1035_v60 = vpop.permute.xlu0 %1034 }
 0x178   : > { %v1128_v12 = vmul.f32 %v2805_v43, %v1035_v60  ;;  %v2821_v60 = vpop.eup %2141 }
 0x179   : > { %v2144_v1 = vpop.eup %2143 }
 0x17a   : > { %1194 = vrot.lane.b32.xlu0 %v1128_v12, %s2369_s9  ;;  %v2827_v36 = vpop.eup %2145  ;;  %v700_v17 = vadd.f32 1.0, %v2144_v1 }
 0x17b   : > { %v1067_v3 = vpop.permute.xlu0 %1066  ;;  %v1037_v21 = vpop.permute.xlu1 %1036 }
 0x17c   : > { %v1144_v27 = vmul.f32 %v2811_v25, %v1067_v3  ;;  %v1129_v12 = vmul.f32 %v2821_v60, %v1037_v21  ;;  %v2830_v3 = vpop.eup %2147  ;;  %2171 = vrcp.f32 %v700_v17 }
 0x17d   : > { %v2150_v53 = vpop.eup %2149 }
 0x17e   : > { %1226 = vrot.lane.b32.xlu0 %v1144_v27, %s2369_s9  ;;  %1196 = vrot.lane.b32.xlu1 %v1129_v12, %s2369_s9  ;;  %v2836_v21 = vpop.eup %2151 }
 0x17f   : > { %v1031_v6 = vpop.permute.xlu0 %1030  ;;  %v1069_v4 = vpop.permute.xlu1 %1068 }
 0x180   : > { %v1126_v54 = vmul.f32 %v2819_v29, %v1031_v6  ;;  %v1145_v6 = vmul.f32 %v2830_v3, %v1069_v4  ;;  %v2840_v12 = vpop.eup %2153 }
 0x181   : > { %v2156_v41 = vpop.eup %2155 }
 0x182   : > { %1190 = vrot.lane.b32.xlu0 %v1126_v54, %s2369_s9  ;;  %v1884_v54 = vmul.f32 -1.442695, %v2660_v46  ;;  %1228 = vrot.lane.b32.xlu1 %v1145_v6, %s2369_s9  ;;  %v2158_v4 = vpop.eup %2157  ;;  %v698_v38 = vadd.f32 1.0, %v2156_v41 }
 0x183   : > { %v1063_v11 = vpop.permute.xlu0 %1062  ;;  %v1033_v42 = vpop.permute.xlu1 %1032 }
 0x184   : > { %v1142_v27 = vmul.f32 %v2827_v36, %v1063_v11  ;;  %v682_v11 = vadd.f32 1.0, %v2150_v53  ;;  %v1127_v0 = vmul.f32 %v2836_v21, %v1033_v42  ;;  %2173 = vpow2.f32 %v1884_v54  ;;  %v2847_v46 = vpop.eup %2159 }
 0x185   : > { %v2162_v28 = vpop.eup %2161  ;;  %v701_v53 = vadd.f32 1.0, %v2158_v4  ;;  %v1867_v4 = vmul.f32 -1.442695, %v2690_v7 }
 0x186   : > { %1222 = vrot.lane.b32.xlu0 %v1142_v27, %s2369_s9  ;;  %v1866_v27 = vmul.f32 -1.442695, %v2667_v50  ;;  %1192 = vrot.lane.b32.xlu1 %v1127_v0, %s2369_s9  ;;  %2175 = vrcp.f32 %v682_v11  ;;  %v2164_v42 = vpop.eup %2163  ;;  %v683_v50 = vadd.f32 1.0, %v2162_v28  ;;  %v1885_v0 = vmul.f32 -1.442695, %v2683_v61 }
 0x187   : > { %v1043_v32 = vpop.permute.xlu0 %1042  ;;  %v1065_v6 = vpop.permute.xlu1 %1064  ;;  %v688_v41 = vadd.f32 1.0, %v2164_v42  ;;  %v1872_v61 = vmul.f32 -1.442695, %v2696_v13 }
 0x188   : > { %v1132_v1 = vmul.f32 %v2840_v12, %v1043_v32  ;;  %v1143_v17 = vmul.f32 %v2847_v46, %v1065_v6  ;;  %2177 = vpow2.f32 %v1866_v27  ;;  %v1882_v32 = vmul.f32 -1.442695, %v2676_v55  ;;  %v2166_v54 = vpop.eup %2165 }
 0x189   : > { %2179 = vrcp.f32 %v698_v38  ;;  %v699_v55 = vadd.f32 1.0, %v2166_v54 }
 0x18a   : > { %1202 = vrot.lane.b32.xlu0 %v1132_v1, %s2369_s9  ;;  %1224 = vrot.lane.b32.xlu1 %v1143_v17, %s2369_s9  ;;  %2181 = vrcp.f32 %v701_v53  ;;  %v2853_v1 = vpop.eup %2167 }
 0x18b   : > { %v1045_v33 = vpop.permute.xlu1 %1044  ;;  %2183 = vpow2.f32 %v1882_v32  ;;  %v2170_v27 = vpop.eup %2169 }
 0x18c   : > { %v1133_v11 = vmul.f32 %v2853_v1, %v1045_v33  ;;  %2185 = vrcp.f32 %v683_v50  ;;  %v2858_v28 = vpop.eup %2171  ;;  %v1075_v38 = vpop.permute.xlu0 %1074  ;;  %v689_v17 = vadd.f32 1.0, %v2170_v27  ;;  %v1883_v33 = vmul.f32 -1.442695, %v2703_v18 }
 0x18d   : > { %2187 = vpow2.f32 %v1885_v0  ;;  %v1148_v6 = vmul.f32 %v2858_v28, %v1075_v38  ;;  %v1873_v0 = vmul.f32 -1.442695, %v2711_v23 }
 0x18e   : > { %1204 = vrot.lane.b32.xlu1 %v1133_v11, %s2369_s9  ;;  %2189 = vrcp.f32 %v688_v41 }
 0x18f   : > { %2191 = vpow2.f32 %v1867_v4  ;;  %1234 = vrot.lane.b32.xlu0 %v1148_v6, %s2369_s9  ;;  %v1077_v18 = vpop.permute.xlu1 %1076 }
 0x190   : > { %2193 = vrcp.f32 %v699_v55  ;;  %v1039_v42 = vpop.permute.xlu0 %1038 }
 0x191   : > { %v2174_v53 = vpop.eup %2173  ;;  %2195 = vpow2.f32 %v1872_v61 }
 0x192   : > { %v704_v32 = vadd.f32 1.0, %v2174_v53  ;;  %2197 = vrcp.f32 %v689_v17 }
 0x193   : > { %v2864_v7 = vpop.eup %2175  ;;  %2199 = vpow2.f32 %v1883_v33  ;;  %v1041_v6 = vpop.permute.xlu1 %1040 }
 0x194   : > { %v1130_v50 = vmul.f32 %v2864_v7, %v1039_v42  ;;  %v1071_v11 = vpop.permute.xlu0 %1070  ;;  %2201 = vrcp.f32 %v704_v32  ;;  %v1870_v32 = vmul.f32 -1.442695, %v2725_v35 }
 0x195   : > { %v2178_v54 = vpop.eup %2177  ;;  %2203 = vpow2.f32 %v1873_v0 }
 0x196   : > { %v2867_v13 = vpop.eup %2179  ;;  %1198 = vrot.lane.b32.xlu0 %v1130_v50, %s2369_s9  ;;  %v686_v4 = vadd.f32 1.0, %v2178_v54 }
 0x197   : > { %v2871_v41 = vpop.eup %2181  ;;  %v1146_v55 = vmul.f32 %v2867_v13, %v1071_v11  ;;  %v1073_v11 = vpop.permute.xlu1 %1072 }
 0x198   : > { %v1149_v27 = vmul.f32 %v2871_v41, %v1077_v18  ;;  %v2184_v38 = vpop.eup %2183  ;;  %2205 = vrcp.f32 %v686_v4  ;;  %v1051_v42 = vpop.permute.xlu0 %1050 }
 0x199   : > { %v2875_v61 = vpop.eup %2185  ;;  %v702_v17 = vadd.f32 1.0, %v2184_v38 }
 0x19a   : > { %1236 = vrot.lane.b32.xlu1 %v1149_v27, %s2369_s9  ;;  %1230 = vrot.lane.b32.xlu0 %v1146_v55, %s2369_s9  ;;  %v2188_v23 = vpop.eup %2187  ;;  %v1131_v33 = vmul.f32 %v2875_v61, %v1041_v6  ;;  %v1886_v55 = vmul.f32 -1.442695, %v2735_v47  ;;  %v1888_v6 = vmul.f32 -1.442695, %v2717_v30 }
 0x19b   : > { %v2879_v53 = vpop.eup %2189  ;;  %v705_v18 = vadd.f32 1.0, %v2188_v23  ;;  %2207 = vrcp.f32 %v702_v17 }
 0x19c   : > { %v1136_v50 = vmul.f32 %v2879_v53, %v1051_v42  ;;  %v2192_v54 = vpop.eup %2191  ;;  %2209 = vpow2.f32 %v1870_v32  ;;  %v1083_v32 = vpop.permute.xlu0 %1082 }
 0x19d   : > { %v2885_v0 = vpop.eup %2193  ;;  %v687_v35 = vadd.f32 1.0, %v2192_v54  ;;  %2211 = vrcp.f32 %v705_v18 }
 0x19e   : > { %1200 = vrot.lane.b32.xlu1 %v1131_v33, %s2369_s9  ;;  %1210 = vrot.lane.b32.xlu0 %v1136_v50, %s2369_s9  ;;  %v1147_v4 = vmul.f32 %v2885_v0, %v1073_v11  ;;  %v2196_v27 = vpop.eup %2195  ;;  %v1053_v33 = vpop.permute.xlu1 %1052  ;;  %v1871_v11 = vmul.f32 -1.442695, %v2746_v62  ;;  %2213 = vpow2.f32 %v1886_v55 }
 0x19f   : > { %v2890_v38 = vpop.eup %2197  ;;  %v692_v42 = vadd.f32 1.0, %v2196_v27  ;;  %2215 = vrcp.f32 %v687_v35 }
 0x1a0   : > { %v2200_v23 = vpop.eup %2199  ;;  %v1137_v50 = vmul.f32 %v2890_v38, %v1053_v33  ;;  %2217 = vpow2.f32 %v1888_v6  ;;  %v1047_v27 = vpop.permute.xlu0 %1046  ;;  %v1889_v33 = vmul.f32 -1.442695, %v2738_v51 }
 0x1a1   : > { %v2895_v17 = vpop.eup %2201  ;;  %v703_v47 = vadd.f32 1.0, %v2200_v23  ;;  %2219 = vrcp.f32 %v692_v42 }
 0x1a2   : > { %1232 = vrot.lane.b32.xlu1 %v1147_v4, %s2369_s9  ;;  %v1152_v54 = vmul.f32 %v2895_v17, %v1083_v32  ;;  %v2204_v18 = vpop.eup %2203  ;;  %2221 = vpow2.f32 %v1871_v11  ;;  %v1887_v4 = vmul.f32 -1.442695, %v2757_v19  ;;  %v1085_v19 = vpop.permute.xlu1 %1084 }
 0x1a3   : > { %2223 = vrcp.f32 %v703_v47  ;;  %v693_v62 = vadd.f32 1.0, %v2204_v18 }
 0x1a4   : > { %1242 = vrot.lane.b32.xlu0 %v1152_v54, %s2369_s9  ;;  %2225 = vpow2.f32 %v1887_v4  ;;  %v1079_v23 = vpop.permute.xlu0 %1078 }
 0x1a5   : > { %v2901_v30 = vpop.eup %2205  ;;  %2227 = vrcp.f32 %v693_v62 }
 0x1a6   : > { %1212 = vrot.lane.b32.xlu1 %v1137_v50, %s2369_s9  ;;  %v1134_v55 = vmul.f32 %v2901_v30, %v1047_v27  ;;  %2229 = vpow2.f32 %v1889_v33  ;;  %v1049_v18 = vpop.permute.xlu1 %1048 }
 0x1a8   : > { %1206 = vrot.lane.b32.xlu0 %v1134_v55, %s2369_s9  ;;  %v2906_v35 = vpop.eup %2207  ;;  %v1059_v55 = vpop.permute.xlu0 %1058 }
 0x1a9   : > { %v2210_v6 = vpop.eup %2209  ;;  %v1150_v42 = vmul.f32 %v2906_v35, %v1079_v23 }
 0x1aa   : > { %v2910_v50 = vpop.eup %2211  ;;  %v690_v32 = vadd.f32 1.0, %v2210_v6  ;;  %v1081_v33 = vpop.permute.xlu1 %1080 }
 0x1ab   : > { %v1153_v11 = vmul.f32 %v2910_v50, %v1085_v19  ;;  %v2214_v47 = vpop.eup %2213 }
 0x1ac   : > { %1238 = vrot.lane.b32.xlu0 %v1150_v42, %s2369_s9  ;;  %v2915_v54 = vpop.eup %2215  ;;  %2231 = vrcp.f32 %v690_v32  ;;  %v706_v62 = vadd.f32 1.0, %v2214_v47  ;;  %v1091_v15 = vpop.permute.xlu0 %1090 }
 0x1ad   : > { %1244 = vrot.lane.b32.xlu1 %v1153_v11, %s2369_s9  ;;  %v2218_v4 = vpop.eup %2217  ;;  %v1135_v51 = vmul.f32 %v2915_v54, %v1049_v18 }
 0x1ae   : > { %v2918_v27 = vpop.eup %2219  ;;  %v708_v11 = vadd.f32 1.0, %v2218_v4  ;;  %2233 = vrcp.f32 %v706_v62  ;;  %v1061_v47 = vpop.permute.xlu1 %1060 }
 0x1af   : > { %v2222_v23 = vpop.eup %2221  ;;  %v1140_v6 = vmul.f32 %v2918_v27, %v1059_v55 }
 0x1b0   : > { %v2922_v42 = vpop.eup %2223  ;;  %v691_v58 = vadd.f32 1.0, %v2222_v23  ;;  %2235 = vrcp.f32 %v708_v11  ;;  %v1055_v62 = vpop.permute.xlu0 %1054 }
 0x1b1   : > { %1208 = vrot.lane.b32.xlu1 %v1135_v51, %s2369_s9  ;;  %3423 = vst [vmem:[#allocation12_spill] sm:$0xff] %v2922_v42  ;;  %v1151_v19 = vmul.f32 %v2922_v42, %v1081_v33  ;;  %1218 = vrot.lane.b32.xlu0 %v1140_v6, %s2369_s9  ;;  %v2226_v18 = vpop.eup %2225 }
 0x1b2   : > { %v2927_v32 = vpop.eup %2227  ;;  %2237 = vrcp.f32 %v691_v58  ;;  %v707_v55 = vadd.f32 1.0, %v2226_v18  ;;  %v1093_v11 = vpop.permute.xlu1 %1092 }
 0x1b3   : > { %v1141_v51 = vmul.f32 %v2927_v32, %v1061_v47  ;;  %v2230_v33 = vpop.eup %2229 }
 0x1b4   : > { %v709_v4 = vadd.f32 1.0, %v2230_v33  ;;  %2239 = vrcp.f32 %v707_v55 }
 0x1b5   : > { %1240 = vrot.lane.b32.xlu1 %v1151_v19, %s2369_s9  ;;  %v1087_v19 = vpop.permute.xlu0 %1086 }
 0x1b6   : > { %2241 = vrcp.f32 %v709_v4  ;;  %v1057_v55 = vpop.permute.xlu1 %1056 }
 0x1b9   : > { %1220 = vrot.lane.b32.xlu1 %v1141_v51, %s2369_s9  ;;  %v2931_v42 = vpop.eup %2231 }
 0x1ba   : > { %v1138_v23 = vmul.f32 %v2931_v42, %v1055_v62  ;;  %v1089_v62 = vpop.permute.xlu1 %1088 }
 0x1bb   : > { %v2935_v6 = vpop.eup %2233 }
 0x1bc   : > { %1214 = vrot.lane.b32.xlu0 %v1138_v23, %s2369_s9  ;;  %v1154_v58 = vmul.f32 %v2935_v6, %v1087_v19 }
 0x1bd   : > { %v2939_v18 = vpop.eup %2235 }
 0x1be   : > { %v1156_v51 = vmul.f32 %v2939_v18, %v1091_v15  ;;  %v968_v15 = vmul.f32 %v2805_v43, %v2657_v45 }
 0x1bf   : > { %v2941_v47 = vpop.eup %2237 }
 0x1c0   : > { %1246 = vrot.lane.b32.xlu0 %v1154_v58, %s2369_s9  ;;  %v1139_v33 = vmul.f32 %v2941_v47, %v1057_v55 }
 0x1c1   : > { %v2947_v4 = vpop.eup %2239 }
 0x1c2   : > { %1216 = vrot.lane.b32.xlu1 %v1139_v33, %s2369_s9  ;;  %3424 = vst [vmem:[#allocation13_spill] sm:$0xff] %v2947_v4  ;;  %v1155_v23 = vmul.f32 %v2947_v4, %v1089_v62  ;;  %v984_v33 = vmul.f32 %v2811_v25, %v2760_v22  ;;  %v982_v22 = vmul.f32 %v2827_v36, %v2749_v5 }
 0x1c3   : > { %v2951_v19 = vpop.eup %2241  ;;  %v967_v5 = vmul.f32 %v2836_v21, %v2651_v40 }
 0x1c4   : > { %1250 = vrot.lane.b32.xlu0 %v1156_v51, %s2369_s9  ;;  %v1157_v58 = vmul.f32 %v2951_v19, %v1093_v11  ;;  %v966_v11 = vmul.f32 %v2819_v29, %v2639_v34 }
 0x1c6   : > { %1248 = vrot.lane.b32.xlu1 %v1155_v23, %s2369_s9  ;;  %v969_v23 = vmul.f32 %v2821_v60, %v2672_v52 }
 0x1ca   : > { %1252 = vrot.lane.b32.xlu1 %v1157_v58, %s2369_s9 }
 0x1ec   : > { %v1195_v55 = vpop.permute.xlu0 %1194 }
 0x1ed   : > { %v2957_v51 = vadd.f32 %v1195_v55, %v968_v15 }
 0x1ef   : > { %2243 = vtanh.f32 %v2957_v51 }
 0x1f0   : > { %v1227_v62 = vpop.permute.xlu0 %1226  ;;  %v1197_v58 = vpop.permute.xlu1 %1196 }
 0x1f1   : > { %v2962_v4 = vadd.f32 %v1227_v62, %v984_v33  ;;  %v2971_v55 = vadd.f32 %v1197_v58, %v969_v23  ;;  %v985_v33 = vmul.f32 %v2830_v3, %v2774_v48  ;;  %v972_v23 = vmul.f32 %v2840_v12, %v2679_v57 }
 0x1f3   : > { %3425 = vst [vmem:[#allocation14_spill] sm:$0xff] %v2962_v4  ;;  %2245 = vtanh.f32 %v2962_v4 }
 0x1f4   : > { %v1191_v45 = vpop.permute.xlu0 %1190  ;;  %v1229_v62 = vpop.permute.xlu1 %1228 }
 0x1f5   : > { %v2969_v15 = vadd.f32 %v1191_v45, %v966_v11  ;;  %v2981_v52 = vadd.f32 %v1229_v62, %v985_v33 }
 0x1f7   : > { %2247 = vtanh.f32 %v2969_v15 }
 0x1f8   : > { %2249 = vtanh.f32 %v2971_v55  ;;  %v1223_v34 = vpop.permute.xlu0 %1222  ;;  %v1193_v48 = vpop.permute.xlu1 %1192 }
 0x1f9   : > { %v2979_v4 = vadd.f32 %v1223_v34, %v982_v22  ;;  %v2990_v58 = vadd.f32 %v1193_v48, %v967_v5  ;;  %v983_v34 = vmul.f32 %v2847_v46, %v2765_v59 }
 0x1fb   : > { %2251 = vtanh.f32 %v2979_v4 }
 0x1fc   : > { %v2244_v11 = vpop.eup %2243  ;;  %2253 = vtanh.f32 %v2981_v52  ;;  %v1203_v45 = vpop.permute.xlu0 %1202 }
 0x1fd   : > { %1386 = vrot.lane.b32.xlu0 %v2244_v11, %s2369_s9  ;;  %v2992_v22 = vadd.f32 %v1203_v45, %v972_v23  ;;  %2255 = vtanh.f32 %v2990_v58  ;;  %v1225_v57 = vpop.permute.xlu1 %1224  ;;  %v973_v23 = vmul.f32 %v2853_v1, %v2699_v16 }
 0x1fe   : > { %v2999_v40 = vadd.f32 %v1225_v57, %v983_v34 }
 0x1ff   : > { %2257 = vtanh.f32 %v2992_v22 }
 0x200   : > { %v2246_v33 = vpop.eup %2245  ;;  %2259 = vtanh.f32 %v2999_v40 }
 0x201   : > { %1418 = vrot.lane.b32.xlu0 %v2246_v33, %s2369_s9  ;;  %v1205_v59 = vpop.permute.xlu1 %1204  ;;  %v988_v33 = vmul.f32 %v2858_v28, %v2777_v63  ;;  %v1235_v34 = vpop.permute.xlu0 %1234 }
 0x202   : > { %v3006_v48 = vadd.f32 %v1205_v59, %v973_v23 }
 0x203   : > { %v3013_v57 = vadd.f32 %v1235_v34, %v988_v33 }
 0x204   : > { %v2248_v62 = vpop.eup %2247  ;;  %2261 = vtanh.f32 %v3006_v48 }
 0x205   : > { %v2250_v11 = vpop.eup %2249  ;;  %1382 = vrot.lane.b32.xlu0 %v2248_v62, %s2369_s9  ;;  %2263 = vtanh.f32 %v3013_v57 }
 0x206   : > { %1388 = vrot.lane.b32.xlu1 %v2250_v11, %s2369_s9  ;;  %v970_v11 = vmul.f32 %v2864_v7, %v2664_v49 }
 0x208   : > { %v2252_v5 = vpop.eup %2251  ;;  %v1199_v23 = vpop.permute.xlu0 %1198 }
 0x209   : > { %v2254_v45 = vpop.eup %2253  ;;  %1414 = vrot.lane.b32.xlu0 %v2252_v5, %s2369_s9  ;;  %v3020_v63 = vadd.f32 %v1199_v23, %v970_v11  ;;  %v986_v5 = vmul.f32 %v2867_v13, %v2767_v31 }
 0x20a   : > { %1420 = vrot.lane.b32.xlu1 %v2254_v45, %s2369_s9  ;;  %v2256_v16 = vpop.eup %2255  ;;  %v989_v45 = vmul.f32 %v2871_v41, %v2788_v37  ;;  %v976_v37 = vmul.f32 %v2879_v53, %v2707_v20  ;;  %v977_v20 = vmul.f32 %v2890_v38, %v2728_v39  ;;  %v974_v39 = vmul.f32 %v2901_v30, %v2693_v10 }
 0x20b   : > { %2265 = vtanh.f32 %v3020_v63  ;;  %v993_v10 = vmul.f32 %v2910_v50, %v2798_v26  ;;  %v980_v26 = vmul.f32 %v2918_v27, %v2731_v44  ;;  %v3434_v44 = vld [vmem:[#allocation7_spill] sm:$0xff] }
 0x20c   : > { %v2258_v62 = vpop.eup %2257  ;;  %v1237_v33 = vpop.permute.xlu1 %1236 }
 0x20d   : > { %1394 = vrot.lane.b32.xlu0 %v2258_v62, %s2369_s9  ;;  %v2260_v59 = vpop.eup %2259  ;;  %v1231_v49 = vpop.permute.xlu0 %1230  ;;  %v3028_v34 = vadd.f32 %v1237_v33, %v989_v45  ;;  %v971_v62 = vmul.f32 %v2875_v61, %v2685_v2 }
 0x20e   : > { %1384 = vrot.lane.b32.xlu1 %v2256_v16, %s2369_s9  ;;  %v3030_v16 = vadd.f32 %v1231_v49, %v986_v5  ;;  %v987_v5 = vmul.f32 %v2885_v0, %v2781_v8  ;;  %v992_v8 = vmul.f32 %v2895_v17, %v2790_v56 }
 0x20f   : > { %2267 = vtanh.f32 %v3028_v34 }
 0x210   : > { %v1201_v31 = vpop.permute.xlu1 %1200  ;;  %2269 = vtanh.f32 %v3030_v16 }
 0x211   : > { %v2262_v11 = vpop.eup %2261  ;;  %v3038_v23 = vadd.f32 %v1201_v31, %v971_v62 }
 0x212   : > { %1416 = vrot.lane.b32.xlu1 %v2260_v59, %s2369_s9  ;;  %v1211_v59 = vpop.permute.xlu0 %1210  ;;  %v2264_v2 = vpop.eup %2263 }
 0x213   : > { %v3041_v45 = vadd.f32 %v1211_v59, %v976_v37  ;;  %2271 = vtanh.f32 %v3038_v23  ;;  %1426 = vrot.lane.b32.xlu0 %v2264_v2, %s2369_s9 }
 0x214   : > { %v1233_v33 = vpop.permute.xlu1 %1232 }
 0x215   : > { %2273 = vtanh.f32 %v3041_v45  ;;  %v3047_v49 = vadd.f32 %v1233_v33, %v987_v5 }
 0x216   : > { %1396 = vrot.lane.b32.xlu1 %v2262_v11, %s2369_s9  ;;  %v1243_v37 = vpop.permute.xlu0 %1242 }
 0x217   : > { %2275 = vtanh.f32 %v3047_v49  ;;  %v3059_v59 = vadd.f32 %v1243_v37, %v992_v8 }
 0x218   : > { %v2266_v62 = vpop.eup %2265  ;;  %v1213_v11 = vpop.permute.xlu1 %1212 }
 0x219   : > { %v3055_v31 = vadd.f32 %v1213_v11, %v977_v20  ;;  %1390 = vrot.lane.b32.xlu0 %v2266_v62, %s2369_s9  ;;  %3426 = vst [vmem:[#allocation15_spill] sm:$0xff] %v3059_v59  ;;  %v990_v11 = vmul.f32 %v2906_v35, %v2784_v14  ;;  %v975_v14 = vmul.f32 %v2915_v54, %v2714_v24 }
 0x21a   : > { %v1207_v33 = vpop.permute.xlu0 %1206 }
 0x21b   : > { %2277 = vtanh.f32 %v3055_v31  ;;  %v3066_v56 = vadd.f32 %v1207_v33, %v974_v39 }
 0x21c   : > { %v2268_v5 = vpop.eup %2267  ;;  %2279 = vtanh.f32 %v3059_v59 }
 0x21d   : > { %v2270_v2 = vpop.eup %2269  ;;  %1428 = vrot.lane.b32.xlu1 %v2268_v5, %s2369_s9  ;;  %3427 = vst [vmem:[#allocation16_spill] sm:$0xff] %v3066_v56  ;;  %2281 = vtanh.f32 %v3066_v56  ;;  %v3440_v56 = vld [vmem:[#allocation11_spill] sm:$0xff] }
 0x21e   : > { %1422 = vrot.lane.b32.xlu0 %v2270_v2, %s2369_s9  ;;  %v1239_v8 = vpop.permute.xlu0 %1238 }
 0x21f   : > { %v3075_v37 = vadd.f32 %v1239_v8, %v990_v11  ;;  %v1245_v2 = vpop.permute.xlu1 %1244 }
 0x220   : > { %v2272_v20 = vpop.eup %2271  ;;  %v3077_v39 = vadd.f32 %v1245_v2, %v993_v10  ;;  %v3431_v10 = vld [vmem:[#allocation12_spill] sm:$0xff] }
 0x221   : > { %1392 = vrot.lane.b32.xlu1 %v2272_v20, %s2369_s9  ;;  %3428 = vst [vmem:[#allocation17_spill] sm:$0xff] %v3075_v37  ;;  %2283 = vtanh.f32 %v3075_v37  ;;  %v991_v2 = vmul.f32 %v3431_v10, %v2792_v9 }
 0x222   : > { %v2274_v62 = vpop.eup %2273  ;;  %3429 = vst [vmem:[#allocation18_spill] sm:$0xff] %v3077_v39  ;;  %2285 = vtanh.f32 %v3077_v39 }
 0x223   : > { %1402 = vrot.lane.b32.xlu0 %v2274_v62, %s2369_s9  ;;  %v1209_v20 = vpop.permute.xlu1 %1208  ;;  %v1219_v8 = vpop.permute.xlu0 %1218 }
 0x224   : > { %v2276_v5 = vpop.eup %2275  ;;  %v3084_v62 = vadd.f32 %v1209_v20, %v975_v14 }
 0x225   : > { %1424 = vrot.lane.b32.xlu1 %v2276_v5, %s2369_s9  ;;  %v3092_v5 = vadd.f32 %v1219_v8, %v980_v26 }
 0x226   : > { %3430 = vst [vmem:[#allocation19_spill] sm:$0xff] %v3084_v62  ;;  %2287 = vtanh.f32 %v3084_v62 }
 0x227   : > { %3432 = vst [vmem:[#allocation12_spill] sm:$0xff] %v3092_v5  ;;  %v1241_v24 = vpop.permute.xlu1 %1240  ;;  %2289 = vtanh.f32 %v3092_v5 }
 0x228   : > { %v2278_v33 = vpop.eup %2277  ;;  %v3095_v39 = vadd.f32 %v1241_v24, %v991_v2 }
 0x229   : > { %1404 = vrot.lane.b32.xlu1 %v2278_v33, %s2369_s9  ;;  %v2280_v11 = vpop.eup %2279  ;;  %v981_v33 = vmul.f32 %v2927_v32, %v3434_v44  ;;  %v3436_v44 = vld [vmem:[#allocation9_spill] sm:$0xff] }
 0x22a   : > { %1434 = vrot.lane.b32.xlu0 %v2280_v11, %s2369_s9  ;;  %3433 = vst [vmem:[#allocation20_spill] sm:$0xff] %v3095_v39  ;;  %v2282_v14 = vpop.eup %2281  ;;  %2291 = vtanh.f32 %v3095_v39 }
 0x22b   : > { %v1221_v9 = vpop.permute.xlu1 %1220 }
 0x22c   : > { %v3102_v20 = vadd.f32 %v1221_v9, %v981_v33  ;;  %v996_v33 = vmul.f32 %v2939_v18, %v3436_v44 }
 0x22e   : > { %1398 = vrot.lane.b32.xlu0 %v2282_v14, %s2369_s9  ;;  %3435 = vst [vmem:[#allocation7_spill] sm:$0xff] %v3102_v20  ;;  %v2284_v26 = vpop.eup %2283  ;;  %2293 = vtanh.f32 %v3102_v20  ;;  %v1215_v8 = vpop.permute.xlu0 %1214 }
 0x22f   : > { %v2286_v11 = vpop.eup %2285 }
 0x230   : > { %1436 = vrot.lane.b32.xlu1 %v2286_v11, %s2369_s9 }
 0x232   : > { %1430 = vrot.lane.b32.xlu0 %v2284_v26, %s2369_s9  ;;  %v1247_v39 = vpop.permute.xlu0 %1246  ;;  %v3437_v26 = vld [vmem:[#allocation5_spill] sm:$0xff] }
 0x233   : > { %v2288_v2 = vpop.eup %2287  ;;  %v978_v5 = vmul.f32 %v2931_v42, %v3437_v26  ;;  %v997_v26 = vmul.f32 %v2951_v19, %v3440_v56 }
 0x234   : > { %1400 = vrot.lane.b32.xlu1 %v2288_v2, %s2369_s9  ;;  %v2290_v24 = vpop.eup %2289  ;;  %v1217_v11 = vpop.permute.xlu1 %1216 }
 0x235   : > { %v3117_v2 = vadd.f32 %v1215_v8, %v978_v5  ;;  %v3442_v8 = vld [vmem:[#allocation10_spill] sm:$0xff] }
 0x236   : > { %1410 = vrot.lane.b32.xlu0 %v2290_v24, %s2369_s9  ;;  %v1251_v9 = vpop.permute.xlu0 %1250  ;;  %v3439_v24 = vld [vmem:[#allocation8_spill] sm:$0xff] }
 0x237   : > { %v2292_v14 = vpop.eup %2291  ;;  %v3114_v62 = vadd.f32 %v1251_v9, %v996_v33  ;;  %v3441_v33 = vld [vmem:[#allocation6_spill] sm:$0xff] }
 0x238   : > { %1432 = vrot.lane.b32.xlu1 %v2292_v14, %s2369_s9  ;;  %v994_v14 = vmul.f32 %v2935_v6, %v3439_v24  ;;  %v1249_v37 = vpop.permute.xlu1 %1248  ;;  %v979_v9 = vmul.f32 %v2941_v47, %v3441_v33  ;;  %v3443_v24 = vld [vmem:[#allocation13_spill] sm:$0xff] }
 0x239   : > { %3438 = vst [vmem:[#allocation9_spill] sm:$0xff] %v3114_v62  ;;  %2295 = vtanh.f32 %v3114_v62  ;;  %v995_v62 = vmul.f32 %v3443_v24, %v3442_v8 }
 0x23a   : > { %2297 = vtanh.f32 %v3117_v2  ;;  %v3123_v44 = vadd.f32 %v1247_v39, %v994_v14  ;;  %v3132_v5 = vadd.f32 %v1217_v11, %v979_v9 }
 0x23b   : > { %v2294_v20 = vpop.eup %2293  ;;  %v3138_v14 = vadd.f32 %v1249_v37, %v995_v62 }
 0x23c   : > { %1412 = vrot.lane.b32.xlu1 %v2294_v20, %s2369_s9  ;;  %v1253_v59 = vpop.permute.xlu1 %1252  ;;  %2299 = vtanh.f32 %v3123_v44 }
 0x23d   : > { %v3129_v20 = vadd.f32 %v1253_v59, %v997_v26 }
 0x23f   : > { %2301 = vtanh.f32 %v3129_v20 }
 0x240   : > { %2303 = vtanh.f32 %v3132_v5 }
 0x241   : > { %2305 = vtanh.f32 %v3138_v14 }
 0x246   : > { %v2296_v39 = vpop.eup %2295 }
 0x247   : > { %1442 = vrot.lane.b32.xlu0 %v2296_v39, %s2369_s9  ;;  %v2298_v56 = vpop.eup %2297 }
 0x249   : > { %v2300_v59 = vpop.eup %2299 }
 0x24b   : > { %1406 = vrot.lane.b32.xlu0 %v2298_v56, %s2369_s9 }
 0x24c   : > { %v2302_v11 = vpop.eup %2301 }
 0x24d   : > { %1444 = vrot.lane.b32.xlu1 %v2302_v11, %s2369_s9  ;;  %v2304_v26 = vpop.eup %2303 }
 0x24e   : > { %v2306_v33 = vpop.eup %2305 }
 0x24f   : > { %1438 = vrot.lane.b32.xlu0 %v2300_v59, %s2369_s9 }
 0x251   : > { %1408 = vrot.lane.b32.xlu1 %v2304_v26, %s2369_s9 }
 0x255   : > { %1440 = vrot.lane.b32.xlu1 %v2306_v33, %s2369_s9 }
 0x26f   : > { %v1387_v37 = vpop.permute.xlu0 %1386 }
 0x270   : > { %v1480_v62 = vmul.f32 %v2805_v43, %v1387_v37 }
 0x272   : > { %1546 = vrot.lane.b32.xlu0 %v1480_v62, %s2370_s12 }
 0x273   : > { %v1419_v9 = vpop.permute.xlu0 %1418 }
 0x274   : > { %v1496_v8 = vmul.f32 %v2811_v25, %v1419_v9 }
 0x276   : > { %1578 = vrot.lane.b32.xlu0 %v1496_v8, %s2370_s12 }
 0x277   : > { %v1383_v39 = vpop.permute.xlu0 %1382 }
 0x278   : > { %v1389_v56 = vpop.permute.xlu1 %1388  ;;  %v1478_v59 = vmul.f32 %v2819_v29, %v1383_v39 }
 0x279   : > { %v1481_v11 = vmul.f32 %v2821_v60, %v1389_v56 }
 0x27a   : > { %1542 = vrot.lane.b32.xlu0 %v1478_v59, %s2370_s12 }
 0x27b   : > { %1548 = vrot.lane.b32.xlu1 %v1481_v11, %s2370_s12  ;;  %v1415_v26 = vpop.permute.xlu0 %1414 }
 0x27c   : > { %v1421_v43 = vpop.permute.xlu1 %1420  ;;  %v1494_v33 = vmul.f32 %v2827_v36, %v1415_v26 }
 0x27d   : > { %v1497_v37 = vmul.f32 %v2830_v3, %v1421_v43 }
 0x27e   : > { %1574 = vrot.lane.b32.xlu0 %v1494_v33, %s2370_s12 }
 0x27f   : > { %1580 = vrot.lane.b32.xlu1 %v1497_v37, %s2370_s12  ;;  %v1395_v29 = vpop.permute.xlu0 %1394 }
 0x280   : > { %v1385_v25 = vpop.permute.xlu1 %1384  ;;  %v1484_v60 = vmul.f32 %v2840_v12, %v1395_v29 }
 0x281   : > { %v1479_v62 = vmul.f32 %v2836_v21, %v1385_v25 }
 0x282   : > { %1554 = vrot.lane.b32.xlu0 %v1484_v60, %s2370_s12 }
 0x283   : > { %1544 = vrot.lane.b32.xlu1 %v1479_v62, %s2370_s12 }
 0x284   : > { %v1417_v9 = vpop.permute.xlu1 %1416 }
 0x285   : > { %v1495_v8 = vmul.f32 %v2847_v46, %v1417_v9  ;;  %v1427_v39 = vpop.permute.xlu0 %1426 }
 0x286   : > { %v1500_v21 = vmul.f32 %v2858_v28, %v1427_v39 }
 0x287   : > { %1576 = vrot.lane.b32.xlu1 %v1495_v8, %s2370_s12 }
 0x288   : > { %v1397_v36 = vpop.permute.xlu1 %1396  ;;  %1586 = vrot.lane.b32.xlu0 %v1500_v21, %s2370_s12 }
 0x289   : > { %v1485_v3 = vmul.f32 %v2853_v1, %v1397_v36 }
 0x28b   : > { %1556 = vrot.lane.b32.xlu1 %v1485_v3, %s2370_s12  ;;  %v1391_v12 = vpop.permute.xlu0 %1390 }
 0x28c   : > { %v1482_v56 = vmul.f32 %v2864_v7, %v1391_v12 }
 0x28e   : > { %1550 = vrot.lane.b32.xlu0 %v1482_v56, %s2370_s12 }
 0x28f   : > { %v1429_v59 = vpop.permute.xlu1 %1428 }
 0x290   : > { %v1501_v46 = vmul.f32 %v2871_v41, %v1429_v59  ;;  %v1423_v11 = vpop.permute.xlu0 %1422 }
 0x291   : > { %v1498_v26 = vmul.f32 %v2867_v13, %v1423_v11 }
 0x292   : > { %1588 = vrot.lane.b32.xlu1 %v1501_v46, %s2370_s12 }
 0x293   : > { %v1393_v1 = vpop.permute.xlu1 %1392  ;;  %1582 = vrot.lane.b32.xlu0 %v1498_v26, %s2370_s12 }
 0x294   : > { %v1483_v28 = vmul.f32 %v2875_v61, %v1393_v1 }
 0x295   : > { %v1403_v43 = vpop.permute.xlu0 %1402 }
 0x296   : > { %v1488_v33 = vmul.f32 %v2879_v53, %v1403_v43  ;;  %1552 = vrot.lane.b32.xlu1 %v1483_v28, %s2370_s12 }
 0x297   : > { %v1425_v7 = vpop.permute.xlu1 %1424 }
 0x298   : > { %1562 = vrot.lane.b32.xlu0 %v1488_v33, %s2370_s12  ;;  %v1499_v41 = vmul.f32 %v2885_v0, %v1425_v7 }
 0x29a   : > { %1584 = vrot.lane.b32.xlu1 %v1499_v41, %s2370_s12 }
 0x29b   : > { %v1405_v13 = vpop.permute.xlu1 %1404 }
 0x29c   : > { %v1489_v37 = vmul.f32 %v2890_v38, %v1405_v13  ;;  %v1435_v25 = vpop.permute.xlu0 %1434 }
 0x29d   : > { %v1504_v62 = vmul.f32 %v2895_v17, %v1435_v25 }
 0x29e   : > { %1564 = vrot.lane.b32.xlu1 %v1489_v37, %s2370_s12 }
 0x29f   : > { %1594 = vrot.lane.b32.xlu0 %v1504_v62, %s2370_s12 }
 0x2a0   : > { %v1399_v61 = vpop.permute.xlu0 %1398 }
 0x2a1   : > { %v1486_v53 = vmul.f32 %v2901_v30, %v1399_v61 }
 0x2a2   : > { %v1437_v60 = vpop.permute.xlu1 %1436 }
 0x2a3   : > { %1558 = vrot.lane.b32.xlu0 %v1486_v53, %s2370_s12  ;;  %v1505_v9 = vmul.f32 %v2910_v50, %v1437_v60 }
 0x2a4   : > { %v1431_v29 = vpop.permute.xlu0 %1430 }
 0x2a5   : > { %v1502_v0 = vmul.f32 %v2906_v35, %v1431_v29  ;;  %1596 = vrot.lane.b32.xlu1 %v1505_v9, %s2370_s12 }
 0x2a6   : > { %v1401_v38 = vpop.permute.xlu1 %1400 }
 0x2a7   : > { %1590 = vrot.lane.b32.xlu0 %v1502_v0, %s2370_s12  ;;  %v1487_v17 = vmul.f32 %v2915_v54, %v1401_v38 }
 0x2a8   : > { %v1411_v8 = vpop.permute.xlu0 %1410 }
 0x2a9   : > { %1560 = vrot.lane.b32.xlu1 %v1487_v17, %s2370_s12  ;;  %v1492_v30 = vmul.f32 %v2918_v27, %v1411_v8 }
 0x2aa   : > { %v1433_v36 = vpop.permute.xlu1 %1432 }
 0x2ab   : > { %v1503_v3 = vmul.f32 %v3431_v10, %v1433_v36  ;;  %1570 = vrot.lane.b32.xlu0 %v1492_v30, %s2370_s12 }
 0x2ad   : > { %1592 = vrot.lane.b32.xlu1 %v1503_v3, %s2370_s12 }
 0x2ae   : > { %v1413_v35 = vpop.permute.xlu1 %1412 }
 0x2af   : > { %v1493_v50 = vmul.f32 %v2927_v32, %v1413_v35 }
 0x2b1   : > { %1572 = vrot.lane.b32.xlu1 %v1493_v50, %s2370_s12 }
 0x2b9   : > { %v1443_v39 = vpop.permute.xlu0 %1442 }
 0x2ba   : > { %v1508_v56 = vmul.f32 %v2939_v18, %v1443_v39 }
 0x2bd   : > { %v1407_v54 = vpop.permute.xlu0 %1406 }
 0x2be   : > { %v1490_v21 = vmul.f32 %v2931_v42, %v1407_v54 }
 0x2bf   : > { %v1445_v12 = vpop.permute.xlu1 %1444 }
 0x2c0   : > { %1566 = vrot.lane.b32.xlu0 %v1490_v21, %s2370_s12  ;;  %v1509_v11 = vmul.f32 %v2951_v19, %v1445_v12 }
 0x2c1   : > { %v1439_v27 = vpop.permute.xlu0 %1438 }
 0x2c2   : > { %v1506_v10 = vmul.f32 %v2935_v6, %v1439_v27 }
 0x2c3   : > { %v1409_v59 = vpop.permute.xlu1 %1408 }
 0x2c4   : > { %1598 = vrot.lane.b32.xlu0 %v1506_v10, %s2370_s12  ;;  %v1491_v32 = vmul.f32 %v2941_v47, %v1409_v59 }
 0x2c6   : > { %1568 = vrot.lane.b32.xlu1 %v1491_v32, %s2370_s12 }
 0x2c7   : > { %v1441_v46 = vpop.permute.xlu1 %1440 }
 0x2c8   : > { %1602 = vrot.lane.b32.xlu0 %v1508_v56, %s2370_s12  ;;  %v1507_v42 = vmul.f32 %v3443_v24, %v1441_v46  ;;  %v3444_v24 = vld [vmem:[#allocation14_spill] sm:$0xff] }
 0x2ca   : > { %1600 = vrot.lane.b32.xlu1 %v1507_v42, %s2370_s12 }
 0x2ce   : > { %1604 = vrot.lane.b32.xlu1 %v1509_v11, %s2370_s12  ;;  %v3445_v11 = vld [vmem:[#allocation15_spill] sm:$0xff] }
 0x2e4   : > { %v1547_v6 = vpop.permute.xlu0 %1546 }
 0x2e5   : > { %v1641_v18 = vsel %vm1638_vm0, %v1547_v6, %v2957_v51 }
 0x2e6   : > { %v1674_v47 = vsel %vm1671_vm1, %v1641_v18, 0.0 }
 0x2e7   : > { %1706 = vst [vmem:[%s3217_s20 + $0x10] sm:$0xff] %v1674_v47  ;;  %v3446_v47 = vld [vmem:[#allocation16_spill] sm:$0xff] }
 0x2e8   : > { %v1579_v19 = vpop.permute.xlu0 %1578 }
 0x2e9   : > { %v1657_v26 = vsel %vm1638_vm0, %v1579_v19, %v3444_v24 }
 0x2ea   : > { %v1690_v1 = vsel %vm1671_vm1, %v1657_v26, 0.0  ;;  %v3447_v26 = vld [vmem:[#allocation17_spill] sm:$0xff] }
 0x2eb   : > { %1722 = vst [vmem:[%s3217_s20 + $0x90] sm:$0xff] %v1690_v1 }
 0x2ec   : > { %v1543_v28 = vpop.permute.xlu0 %1542 }
 0x2ed   : > { %v1549_v51 = vpop.permute.xlu1 %1548  ;;  %v1639_v43 = vsel %vm1638_vm0, %v1543_v28, %v2969_v15 }
 0x2ee   : > { %v1642_v33 = vsel %vm1638_vm0, %v1549_v51, %v2971_v55  ;;  %v1672_v7 = vsel %vm1671_vm1, %v1639_v43, 0.0  ;;  %v3448_v43 = vld [vmem:[#allocation18_spill] sm:$0xff] }
 0x2ef   : > { %v1675_v41 = vsel %vm1671_vm1, %v1642_v33, 0.0  ;;  %1704 = vst [vmem:[%s3217_s20] sm:$0xff] %v1672_v7 }
 0x2f0   : > { %1707 = vst [vmem:[%s3217_s20 + $0x18] sm:$0xff] %v1675_v41  ;;  %v1575_v13 = vpop.permute.xlu0 %1574 }
 0x2f1   : > { %v1581_v37 = vpop.permute.xlu1 %1580  ;;  %v1655_v25 = vsel %vm1638_vm0, %v1575_v13, %v2979_v4  ;;  %v3449_v13 = vld [vmem:[#allocation19_spill] sm:$0xff] }
 0x2f2   : > { %v1658_v62 = vsel %vm1638_vm0, %v1581_v37, %v2981_v52  ;;  %v1688_v15 = vsel %vm1671_vm1, %v1655_v25, 0.0 }
 0x2f3   : > { %v1691_v55 = vsel %vm1671_vm1, %v1658_v62, 0.0  ;;  %1720 = vst [vmem:[%s3217_s20 + $0x80] sm:$0xff] %v1688_v15  ;;  %v3450_v15 = vld [vmem:[#allocation12_spill] sm:$0xff] }
 0x2f4   : > { %1723 = vst [vmem:[%s3217_s20 + $0x98] sm:$0xff] %v1691_v55  ;;  %v1555_v29 = vpop.permute.xlu0 %1554 }
 0x2f5   : > { %v1545_v61 = vpop.permute.xlu1 %1544  ;;  %v1645_v4 = vsel %vm1638_vm0, %v1555_v29, %v2992_v22  ;;  %v3451_v29 = vld [vmem:[#allocation20_spill] sm:$0xff] }
 0x2f6   : > { %v1640_v53 = vsel %vm1638_vm0, %v1545_v61, %v2990_v58  ;;  %v1678_v52 = vsel %vm1671_vm1, %v1645_v4, 0.0 }
 0x2f7   : > { %v1673_v0 = vsel %vm1671_vm1, %v1640_v53, 0.0  ;;  %1710 = vst [vmem:[%s3217_s20 + $0x30] sm:$0xff] %v1678_v52 }
 0x2f8   : > { %1705 = vst [vmem:[%s3217_s20 + $0x8] sm:$0xff] %v1673_v0 }
 0x2f9   : > { %v1577_v60 = vpop.permute.xlu1 %1576 }
 0x2fa   : > { %v1656_v9 = vsel %vm1638_vm0, %v1577_v60, %v2999_v40  ;;  %v1587_v22 = vpop.permute.xlu0 %1586  ;;  %v3452_v60 = vld [vmem:[#allocation7_spill] sm:$0xff] }
 0x2fb   : > { %v1689_v38 = vsel %vm1671_vm1, %v1656_v9, 0.0  ;;  %v1661_v30 = vsel %vm1638_vm0, %v1587_v22, %v3013_v57 }
 0x2fc   : > { %1721 = vst [vmem:[%s3217_s20 + $0x88] sm:$0xff] %v1689_v38  ;;  %v1694_v36 = vsel %vm1671_vm1, %v1661_v30, 0.0 }
 0x2fd   : > { %v1557_v58 = vpop.permute.xlu1 %1556  ;;  %1726 = vst [vmem:[%s3217_s20 + $0xb0] sm:$0xff] %v1694_v36 }
 0x2fe   : > { %v1646_v17 = vsel %vm1638_vm0, %v1557_v58, %v3006_v48 }
 0x2ff   : > { %v1679_v8 = vsel %vm1671_vm1, %v1646_v17, 0.0 }
 0x300   : > { %1711 = vst [vmem:[%s3217_s20 + $0x38] sm:$0xff] %v1679_v8  ;;  %v1551_v40 = vpop.permute.xlu0 %1550 }
 0x301   : > { %v1643_v3 = vsel %vm1638_vm0, %v1551_v40, %v3020_v63 }
 0x302   : > { %v1676_v35 = vsel %vm1671_vm1, %v1643_v3, 0.0 }
 0x303   : > { %1708 = vst [vmem:[%s3217_s20 + $0x20] sm:$0xff] %v1676_v35  ;;  %v3453_v35 = vld [vmem:[#allocation9_spill] sm:$0xff] }
 0x304   : > { %v1589_v48 = vpop.permute.xlu1 %1588 }
 0x305   : > { %v1662_v50 = vsel %vm1638_vm0, %v1589_v48, %v3028_v34  ;;  %v1583_v39 = vpop.permute.xlu0 %1582 }
 0x306   : > { %v1695_v54 = vsel %vm1671_vm1, %v1662_v50, 0.0  ;;  %v1659_v57 = vsel %vm1638_vm0, %v1583_v39, %v3030_v16 }
 0x307   : > { %1727 = vst [vmem:[%s3217_s20 + $0xb8] sm:$0xff] %v1695_v54  ;;  %v1692_v21 = vsel %vm1671_vm1, %v1659_v57, 0.0 }
 0x308   : > { %v1553_v63 = vpop.permute.xlu1 %1552  ;;  %1724 = vst [vmem:[%s3217_s20 + $0xa0] sm:$0xff] %v1692_v21 }
 0x309   : > { %v1644_v27 = vsel %vm1638_vm0, %v1553_v63, %v3038_v23 }
 0x30a   : > { %v1563_v12 = vpop.permute.xlu0 %1562  ;;  %v1677_v10 = vsel %vm1671_vm1, %v1644_v27, 0.0 }
 0x30b   : > { %v1649_v34 = vsel %vm1638_vm0, %v1563_v12, %v3041_v45  ;;  %1709 = vst [vmem:[%s3217_s20 + $0x28] sm:$0xff] %v1677_v10 }
 0x30c   : > { %v1682_v56 = vsel %vm1671_vm1, %v1649_v34, 0.0  ;;  %v1585_v16 = vpop.permute.xlu1 %1584 }
 0x30d   : > { %1714 = vst [vmem:[%s3217_s20 + $0x50] sm:$0xff] %v1682_v56  ;;  %v1660_v59 = vsel %vm1638_vm0, %v1585_v16, %v3047_v49 }
 0x30e   : > { %v1693_v32 = vsel %vm1671_vm1, %v1660_v59, 0.0 }
 0x30f   : > { %1725 = vst [vmem:[%s3217_s20 + $0xa8] sm:$0xff] %v1693_v32 }
 0x310   : > { %v1565_v23 = vpop.permute.xlu1 %1564 }
 0x311   : > { %v1650_v46 = vsel %vm1638_vm0, %v1565_v23, %v3055_v31  ;;  %v1595_v45 = vpop.permute.xlu0 %1594 }
 0x312   : > { %v1683_v42 = vsel %vm1671_vm1, %v1650_v46, 0.0  ;;  %v1665_v6 = vsel %vm1638_vm0, %v1595_v45, %v3445_v11 }
 0x313   : > { %1715 = vst [vmem:[%s3217_s20 + $0x58] sm:$0xff] %v1683_v42  ;;  %v1698_v18 = vsel %vm1671_vm1, %v1665_v6, 0.0 }
 0x314   : > { %1730 = vst [vmem:[%s3217_s20 + $0xd0] sm:$0xff] %v1698_v18 }
 0x315   : > { %v1559_v49 = vpop.permute.xlu0 %1558 }
 0x316   : > { %v1647_v19 = vsel %vm1638_vm0, %v1559_v49, %v3446_v47 }
 0x317   : > { %v1680_v24 = vsel %vm1671_vm1, %v1647_v19, 0.0  ;;  %v1597_v28 = vpop.permute.xlu1 %1596 }
 0x318   : > { %1712 = vst [vmem:[%s3217_s20 + $0x40] sm:$0xff] %v1680_v24  ;;  %v1666_v33 = vsel %vm1638_vm0, %v1597_v28, %v3448_v43 }
 0x319   : > { %v1591_v31 = vpop.permute.xlu0 %1590  ;;  %v1699_v7 = vsel %vm1671_vm1, %v1666_v33, 0.0 }
 0x31a   : > { %v1663_v1 = vsel %vm1638_vm0, %v1591_v31, %v3447_v26  ;;  %1731 = vst [vmem:[%s3217_s20 + $0xd8] sm:$0xff] %v1699_v7 }
 0x31b   : > { %v1696_v51 = vsel %vm1671_vm1, %v1663_v1, 0.0  ;;  %v1561_v41 = vpop.permute.xlu1 %1560 }
 0x31c   : > { %1728 = vst [vmem:[%s3217_s20 + $0xc0] sm:$0xff] %v1696_v51  ;;  %v1648_v37 = vsel %vm1638_vm0, %v1561_v41, %v3449_v13 }
 0x31d   : > { %v1681_v25 = vsel %vm1671_vm1, %v1648_v37, 0.0  ;;  %v1571_v62 = vpop.permute.xlu0 %1570 }
 0x31e   : > { %1713 = vst [vmem:[%s3217_s20 + $0x48] sm:$0xff] %v1681_v25  ;;  %v1653_v55 = vsel %vm1638_vm0, %v1571_v62, %v3450_v15 }
 0x31f   : > { %v1593_v61 = vpop.permute.xlu1 %1592  ;;  %v1686_v53 = vsel %vm1671_vm1, %v1653_v55, 0.0 }
 0x320   : > { %v1664_v0 = vsel %vm1638_vm0, %v1593_v61, %v3451_v29  ;;  %1718 = vst [vmem:[%s3217_s20 + $0x70] sm:$0xff] %v1686_v53 }
 0x321   : > { %v1697_v4 = vsel %vm1671_vm1, %v1664_v0, 0.0 }
 0x322   : > { %1729 = vst [vmem:[%s3217_s20 + $0xc8] sm:$0xff] %v1697_v4 }
 0x323   : > { %v1573_v52 = vpop.permute.xlu1 %1572 }
 0x324   : > { %v1654_v9 = vsel %vm1638_vm0, %v1573_v52, %v3452_v60 }
 0x325   : > { %v1687_v38 = vsel %vm1671_vm1, %v1654_v9, 0.0 }
 0x326   : > { %1719 = vst [vmem:[%s3217_s20 + $0x78] sm:$0xff] %v1687_v38 }
 0x332   : > { %v1567_v58 = vpop.permute.xlu0 %1566 }
 0x333   : > { %v1651_v17 = vsel %vm1638_vm0, %v1567_v58, %v3117_v2 }
 0x334   : > { %v1684_v8 = vsel %vm1671_vm1, %v1651_v17, 0.0 }
 0x335   : > { %1716 = vst [vmem:[%s3217_s20 + $0x60] sm:$0xff] %v1684_v8 }
 0x336   : > { %v1599_v22 = vpop.permute.xlu0 %1598 }
 0x337   : > { %v1667_v30 = vsel %vm1638_vm0, %v1599_v22, %v3123_v44 }
 0x338   : > { %v1700_v36 = vsel %vm1671_vm1, %v1667_v30, 0.0  ;;  %v1569_v3 = vpop.permute.xlu1 %1568 }
 0x339   : > { %1732 = vst [vmem:[%s3217_s20 + $0xe0] sm:$0xff] %v1700_v36  ;;  %v1652_v2 = vsel %vm1638_vm0, %v1569_v3, %v3132_v5 }
 0x33a   : > { %v1603_v40 = vpop.permute.xlu0 %1602  ;;  %v1685_v39 = vsel %vm1671_vm1, %v1652_v2, 0.0 }
 0x33b   : > { %v1669_v48 = vsel %vm1638_vm0, %v1603_v40, %v3453_v35  ;;  %1717 = vst [vmem:[%s3217_s20 + $0x68] sm:$0xff] %v1685_v39 }
 0x33c   : > { %v1702_v50 = vsel %vm1671_vm1, %v1669_v48, 0.0  ;;  %v1601_v44 = vpop.permute.xlu1 %1600 }
 0x33d   : > { %1734 = vst [vmem:[%s3217_s20 + $0xf0] sm:$0xff] %v1702_v50  ;;  %v1668_v54 = vsel %vm1638_vm0, %v1601_v44, %v3138_v14 }
 0x33e   : > { %v1701_v57 = vsel %vm1671_vm1, %v1668_v54, 0.0 }
 0x33f   : > { %1733 = vst [vmem:[%s3217_s20 + $0xe8] sm:$0xff] %v1701_v57 }
 0x340   : > { %v1605_v21 = vpop.permute.xlu1 %1604 }
 0x341   : > { %v1670_v5 = vsel %vm1638_vm0, %v1605_v21, %v3129_v20 }
 0x342   : > { %v1703_v14 = vsel %vm1671_vm1, %v1670_v5, 0.0 }
 0x343   : > { %1735 = vst [vmem:[%s3217_s20 + $0xf8] sm:$0xff] %v1703_v14 }
 0x344   : > { %2320 = shalt.err (!%p2317_p3)
}
 0x345   : > { %s2321_s8 = scalar_lea.hbm %s3345_s30, 4096  ;;  %s2325_s11 = scalar_lea.hbm %s3399_s4, 8192 }
 0x346   : > { %p2322_p4 = scmp.ne.s32.totalorder %s3345_s30, %s2321_s8  ;;  %p2326_p9 = scmp.lt.s32.totalorder %s3345_s30, %s3399_s4 }
 0x347   : > { %p2327_p10 = scmp.lt.s32.totalorder %s2325_s11, %s2321_s8 }
 0x348   : > { %p2323_p7 = pnand %p2322_p4, %p2437_p5 }
 0x349   : > { %p2328_p11 = por %p2327_p10, %p2326_p9 }
 0x34a   : > { %p2324_p8 = pneg %p2323_p7 }
 0x34c   : > { %p2329_p12 = pnand %p2328_p11, %p2324_p8 }
 0x34e   : > { %2332 = shalt.err (!%p2329_p12)
}
 0x34f   : > { %s2372_s14 = smov 128   ;;  %s2373_s20 = smov 8  }
 0x350   : > { %1984 = dma.vmem_to_hbm [thread:$0]  (%p2437_p5), %s3347_s23, 4096, %s3345_s30, %s3355_s19, %s2372_s14, %s2372_s14, %s2373_s20  }
 0x351 PF: > { %p1990_p13 = scmp.ge.s32.totalorder %s2367_s18, 2  ;;  %s1765_s22 = sand.u32 1, %s2355_s15  }
 0x352   : > { %s1766_s27 = scalar_lea.sflag [#allocation3], %s1765_s22 }
 0x353   : > { %p1987_p0 = pnand %p1990_p13, %p2441_p6 }
 0x355   : > { %p1988_p1 = pneg %p1987_p0 }
 0x357   : > { %2350 = dma.done.wait (%p1988_p1), %s1766_s27, 4096  }
 0x358   : > { %2352 = vsyncadd (%p1988_p1), %s1766_s27, 4294963200  ;;  %p14_p2 = scmp.ge.s32.totalorder %s2424_s21, 4   ;;  %s3454_s15 = smov %s2359_s16 }
 0x359   : > { %s3455_s16 = smov %s2363_s17  ;;  %s3456_s17 = smov %s2435_s24 }
 0x35a   : > { %s3457_s18 = smov %s2424_s21  ;;  %16 = sbr.rel (!%p14_p2) target bundleno = 3 (0x3), region = 74 }
 0x35f   :  { %1771 = vsyncpa [#allocation3], 1 }
 0x360   :  { %1773 = vsyncpa [#allocation3 + $0x1], 1 }

</bundles_post_ra>
